<compile_context>
chip_gen: v6e
topology: v6e:2x2x1
jax: 0.10.0
libtpu: 0.0.40
codegen_flags: <defaults>
</compile_context>

<pallas_src>
import jax
import jax.numpy as jnp
from jax.experimental import pallas as pl
from jax.experimental.pallas import tpu as pltpu

EPS = 1e-5


# ----------------------------- weight preprocessing ------------------------------- #

def _conv3x3_band_weights(w_oihw, W):
    """Fold the kw taps of a 3x3 conv (pad=1) into banded (W*Cin, W*Cout) slabs, one per kh.

    B[kh][x*Cin + ci, w*Cout + co] = w_oihw[co, ci, kh, kw]  with x = w + kw - 1 (in range),
    so that  conv_out[h] = sum_kh  act_rowpad[h + kh] @ B[kh],
    where act_rowpad is (H+2, W*Cin) with zero rows 0 and H+1 and NO column padding
    (out-of-range column taps are simply absent from the band -> implicit zero padding).
    """
    KW = 3
    k = jnp.arange(KW)[:, None, None]
    x = jnp.arange(W)[None, :, None]
    w = jnp.arange(W)[None, None, :]
    S = (x == w + k - 1).astype(jnp.float32)                    # (KW, W, W)
    R = jnp.einsum('kxw,oihk->hxiwo', S, w_oihw)                # (KH, W, Cin, W, Cout)
    KH, _, Cin, _, Cout = R.shape
    return R.reshape(KH, W * Cin, W * Cout)


def _deconv4x4s2_polyphase_weights(wt_iohw, W):
    """Polyphase decomposition of ConvTranspose2d(k=4, s=2, p=1) into banded slabs.

    Output pixel (2h + r, 2w + s) = bias + sum_dy  act_rowpad[h + r + dy] @ Bup[r, dy]
    with the two column parities s interleaved into the lane dimension:
    Bup[r, dy] has shape (W*Cin, W*2*Cout), column index = w*(2*Cout) + s*Cout + co.
    Only real (non-zero) input pixels are ever multiplied.
    """
    Cin, Cout, _, _ = wt_iohw.shape
    kmap = jnp.array([[3, 1], [2, 0]])                          # [parity, tap] -> kernel index
    # wt_g[ci, co, r, dy, s, dx] = wt[ci, co, ky(r,dy), kx(s,dx)]
    wt_g = wt_iohw[:, :, kmap[:, :, None, None], kmap[None, None, :, :]]
    s_i = jnp.arange(2)[:, None, None, None]
    d_i = jnp.arange(2)[None, :, None, None]
    x_i = jnp.arange(W)[None, None, :, None]
    w_i = jnp.arange(W)[None, None, None, :]
    Su = (x_i == w_i + s_i + d_i - 1).astype(jnp.float32)       # (s, dx, W, W)
    R = jnp.einsum('sdxw,iorysd->ryxiwso', Su, wt_g)            # (r, dy, W, Cin, W, s, Cout)
    return R.reshape(2, 2, W * Cin, W * 2 * Cout)


def _tile_cols(vec, W, C):
    """(C,) per-channel vector -> (1, W*C) channel-interleaved row."""
    return jnp.tile(vec, W).reshape(1, W * C)


def _bn_scale_shift(stats, gamma, beta, *, W, C, count):
    """Finish training-mode BN from per-image partial sums (tiny JAX reduction)."""
    s = stats.reshape(stats.shape[0], 2, W, C).sum(axis=(0, 2))   # (2, C)
    mean = s[0] / count
    var = s[1] / count - mean * mean                              # biased variance
    scale = gamma / jnp.sqrt(var + EPS)
    shift = beta - mean * scale
    return scale, shift


# --------------------------------- Pallas kernels ---------------------------------- #

def _fused_conv3x3(x_rp, B, bias_t, scale_t, shift_t, *, W, Cout, apply_bnrelu):
    """(optional BN-affine + ReLU prologue) -> 3x3 conv (pad=1) -> row-padded output + stats.

    x_rp:    (N, H+2, W*Cin) row-zero-bordered, channel-interleaved activation.
    B:       (3, W*Cin, W*Cout) banded weight slabs (column padding folded in).
    bias_t:  (1, W*Cout) conv bias tiled over W.
    scale_t/shift_t: (1, W*Cin) BN affine of the *previous* layer (used iff apply_bnrelu).
    Returns:
      out_rp: (N, H+2, W*Cout) raw conv output with zero border rows (directly the
              next kernel's input -- no XLA pad pass between layers).
      stats:  (N, 2, W*Cout) per-image [sum over rows, sum of squares over rows].
    """
    N, Hp, WCin = x_rp.shape
    H = Hp - 2
    WCout = W * Cout

    def kernel(*refs):
        if apply_bnrelu:
            x_ref, scale_ref, shift_ref, b_ref, bias_ref, out_ref, stats_ref = refs
        else:
            x_ref, b_ref, bias_ref, out_ref, stats_ref = refs
        x = x_ref[...]
        if apply_bnrelu:
            # BN affine + ReLU of the previous layer; keep the zero border rows exact 0.
            ridx = jax.lax.broadcasted_iota(jnp.int32, (Hp, 1), 0)
            interior = jnp.logical_and(ridx >= 1, ridx <= H)
            act = jnp.where(interior,
                            jnp.maximum(x * scale_ref[...] + shift_ref[...], 0.0),
                            0.0)
        else:
            act = x
        # 3x3 conv as three row-tap matmuls against the banded slabs (MXU, f32 accum).
        acc = jnp.dot(act[0:H, :], b_ref[0], preferred_element_type=jnp.float32)
        acc = acc + jnp.dot(act[1:1 + H, :], b_ref[1], preferred_element_type=jnp.float32)
        acc = acc + jnp.dot(act[2:2 + H, :], b_ref[2], preferred_element_type=jnp.float32)
        res = acc + bias_ref[...]                               # (H, W*Cout), lane-dense
        # Write the next layer's row-zero-bordered input directly (lane-aligned stores).
        out_ref[0:1, :] = jnp.zeros((1, WCout), jnp.float32)
        out_ref[Hp - 1:Hp, :] = jnp.zeros((1, WCout), jnp.float32)
        out_ref[1:1 + H, :] = res
        # Partial BatchNorm statistics (tiny).
        stats_ref[0:1, :] = jnp.sum(res, axis=0, keepdims=True)
        stats_ref[1:2, :] = jnp.sum(res * res, axis=0, keepdims=True)

    def full(shape):
        return pl.BlockSpec(shape, lambda n: (0,) * len(shape))

    in_specs = [pl.BlockSpec((None, Hp, WCin), lambda n: (n, 0, 0))]
    inputs = [x_rp]
    if apply_bnrelu:
        in_specs += [full((1, WCin)), full((1, WCin))]
        inputs += [scale_t, shift_t]
    in_specs += [full((3, WCin, WCout)), full((1, WCout))]
    inputs += [B, bias_t]

    return pl.pallas_call(
        kernel,
        out_shape=(jax.ShapeDtypeStruct((N, Hp, WCout), jnp.float32),
                   jax.ShapeDtypeStruct((N, 2, WCout), jnp.float32)),
        grid_spec=pltpu.PrefetchScalarGridSpec(
            num_scalar_prefetch=0,
            grid=(N,),
            in_specs=in_specs,
            out_specs=(pl.BlockSpec((None, Hp, WCout), lambda n: (n, 0, 0)),
                       pl.BlockSpec((None, 2, WCout), lambda n: (n, 0, 0)))),
        compiler_params=pltpu.CompilerParams(
            dimension_semantics=("parallel",)),
    )(*inputs)


def _fused_bnrelu_convtranspose(x_rp, Bup, bias_t, scale_t, shift_t, *, W, Cout):
    """BN-affine + ReLU prologue -> polyphase ConvTranspose2d(k=4, s=2, p=1).

    Output: (N, 2, H, 2*W*Cout) indexed [n, row-parity, h, w*(2*Cout) + col-parity*Cout + co]
    (column parities interleaved in the lane dim -> 4 lane-dense matmuls per image).
    """
    N, Hp, WCin = x_rp.shape
    H = Hp - 2
    WCout2 = W * 2 * Cout

    def kernel(x_ref, scale_ref, shift_ref, b_ref, bias_ref, out_ref):
        ridx = jax.lax.broadcasted_iota(jnp.int32, (Hp, 1), 0)
        interior = jnp.logical_and(ridx >= 1, ridx <= H)
        act = jnp.where(interior,
                        jnp.maximum(x_ref[...] * scale_ref[...] + shift_ref[...], 0.0),
                        0.0)
        for r in range(2):
            acc = jnp.dot(act[r:r + H, :], b_ref[r, 0],
                          preferred_element_type=jnp.float32)
            acc = acc + jnp.dot(act[r + 1:r + 1 + H, :], b_ref[r, 1],
                                preferred_element_type=jnp.float32)
            out_ref[r] = acc + bias_ref[...]

    def full(shape):
        return pl.BlockSpec(shape, lambda n: (0,) * len(shape))

    return pl.pallas_call(
        kernel,
        out_shape=jax.ShapeDtypeStruct((N, 2, H, WCout2), jnp.float32),
        grid_spec=pltpu.PrefetchScalarGridSpec(
            num_scalar_prefetch=0,
            grid=(N,),
            in_specs=[pl.BlockSpec((None, Hp, WCin), lambda n: (n, 0, 0)),
                      full((1, WCin)), full((1, WCin)),
                      full((2, 2, WCin, WCout2)), full((1, WCout2))],
            out_specs=pl.BlockSpec((None, 2, H, WCout2),
                                   lambda n: (n, 0, 0, 0))),
        compiler_params=pltpu.CompilerParams(
            dimension_semantics=("parallel",)),
    )(x_rp, scale_t, shift_t, Bup, bias_t)


# ---------------------------------- forward pass ----------------------------------- #

def unet_block_up_forward(x_nchw, skip_nchw, p):
    """UNetBlockUp (transpose=True) forward, training-mode BatchNorm.  NCHW in/out."""
    xcat = jnp.concatenate([skip_nchw, x_nchw], axis=1)          # torch.concat((skip, x), 1)
    N, Cin, H, W = xcat.shape
    Cmid = p["conv1_w"].shape[0]
    Cout = p["up_w"].shape[1]
    count = N * H * W

    # Entry layout plumbing (one small fused XLA pass over the raw inputs):
    # NCHW -> NHWC -> flatten width & channels -> zero-pad rows only.
    x0 = jnp.transpose(xcat, (0, 2, 3, 1)).reshape(N, H, W * Cin)
    x0 = jnp.pad(x0, ((0, 0), (1, 1), (0, 0)))                   # (N, H+2, W*Cin)

    # conv1 (+ BN1 partial stats)
    B1 = _conv3x3_band_weights(p["conv1_w"], W)
    c1, st1 = _fused_conv3x3(x0, B1, _tile_cols(p["conv1_b"], W, Cmid),
                             None, None, W=W, Cout=Cmid, apply_bnrelu=False)
    sc1, sh1 = _bn_scale_shift(st1, p["bn1_g"], p["bn1_b"], W=W, C=Cmid, count=count)

    # conv2 with fused BN1-affine + ReLU prologue (+ BN2 partial stats)
    B2 = _conv3x3_band_weights(p["conv2_w"], W)
    c2, st2 = _fused_conv3x3(c1, B2, _tile_cols(p["conv2_b"], W, Cmid),
                             _tile_cols(sc1, W, Cmid), _tile_cols(sh1, W, Cmid),
                             W=W, Cout=Cmid, apply_bnrelu=True)
    sc2, sh2 = _bn_scale_shift(st2, p["bn2_g"], p["bn2_b"], W=W, C=Cmid, count=count)

    # up-conv with fused BN2-affine + ReLU prologue, polyphase, column parities in lanes.
    Bup = _deconv4x4s2_polyphase_weights(p["up_w"], W)
    up_bias = jnp.tile(p["up_b"], 2 * W).reshape(1, 2 * W * Cout)
    up = _fused_bnrelu_convtranspose(c2, Bup, up_bias,
                                     _tile_cols(sc2, W, Cmid), _tile_cols(sh2, W, Cmid),
                                     W=W, Cout=Cout)

    # Exit layout plumbing: de-interleave parities and return NCHW.
    up = up.reshape(N, 2, H, W, 2, Cout)                          # (n, r, h, w, s, co)
    up = jnp.transpose(up, (0, 5, 2, 1, 3, 4)).reshape(N, Cout, 2 * H, 2 * W)
    return up


# ------------------------------- pure-JAX reference -------------------------------- #

def _reference(x_nchw, skip_nchw, p):
    xcat = jnp.concatenate([skip_nchw, x_nchw], axis=1)

    def conv(x, w, b):
        y = jax.lax.conv_general_dilated(
            x, w, (1, 1), ((1, 1), (1, 1)),
            dimension_numbers=("NCHW", "OIHW", "NCHW"))
        return y + b.reshape(1, -1, 1, 1)

    def bnrelu(x, g, bb):
        m = jnp.mean(x, axis=(0, 2, 3), keepdims=True)
        v = jnp.var(x, axis=(0, 2, 3), keepdims=True)
        y = (x - m) / jnp.sqrt(v + EPS) * g.reshape(1, -1, 1, 1) + bb.reshape(1, -1, 1, 1)
        return jnp.maximum(y, 0.0)

    a1 = bnrelu(conv(xcat, p["conv1_w"], p["conv1_b"]), p["bn1_g"], p["bn1_b"])
    a2 = bnrelu(conv(a1, p["conv2_w"], p["conv2_b"]), p["bn2_g"], p["bn2_b"])
    w_eq = jnp.transpose(jnp.flip(p["up_w"], axis=(2, 3)), (1, 0, 2, 3))  # (Cout, Cin, 4, 4)
    up = jax.lax.conv_general_dilated(
        a2, w_eq, (1, 1), ((2, 2), (2, 2)), lhs_dilation=(2, 2),
        dimension_numbers=("NCHW", "OIHW", "NCHW"))
    return up + p["up_b"].reshape(1, -1, 1, 1)


# ---------------------------------------- main -------------------------------------- #

if __name__ == "__main__":
    key = jax.random.PRNGKey(0)
    N, Cx, Cskip, H, W = 2, 4, 4, 16, 16
    in_ch, mid_ch, out_ch = Cskip + Cx, 8, 4

    ks = jax.random.split(key, 12)
    params = {
        "conv1_w": jax.random.normal(ks[0], (mid_ch, in_ch, 3, 3), jnp.float32) * 0.1,
        "conv1_b": jax.random.normal(ks[1], (mid_ch,), jnp.float32) * 0.1,
        "conv2_w": jax.random.normal(ks[2], (mid_ch, mid_ch, 3, 3), jnp.float32) * 0.1,
        "conv2_b": jax.random.normal(ks[3], (mid_ch,), jnp.float32) * 0.1,
        "bn1_g": 1.0 + 0.1 * jax.random.normal(ks[4], (mid_ch,), jnp.float32),
        "bn1_b": 0.1 * jax.random.normal(ks[5], (mid_ch,), jnp.float32),
        "bn2_g": 1.0 + 0.1 * jax.random.normal(ks[6], (mid_ch,), jnp.float32),
        "bn2_b": 0.1 * jax.random.normal(ks[7], (mid_ch,), jnp.float32),
        # ConvTranspose2d weight shape: (in_channels, out_channels, 4, 4)
        "up_w": jax.random.normal(ks[8], (mid_ch, out_ch, 4, 4), jnp.float32) * 0.1,
        "up_b": jax.random.normal(ks[9], (out_ch,), jnp.float32) * 0.1,
    }

    x = jax.random.normal(ks[10], (N, Cx, H, W), jnp.float32)
    skip = jax.random.normal(ks[11], (N, Cskip, H, W), jnp.float32)

    fwd = jax.jit(unet_block_up_forward)
    out = jax.block_until_ready(fwd(x, skip, params))
    assert out.shape == (N, out_ch, 2 * H, 2 * W), out.shape

    ref = jax.block_until_ready(_reference(x, skip, params))
    assert jnp.allclose(out, ref, atol=1e-4, rtol=1e-4), \
        float(jnp.max(jnp.abs(out - ref)))

    print("KERNEL_OK")
</pallas_src>

<mosaic_0001>
module attributes {stable_mosaic.version = 11 : i64} {
  func.func @kernel(%arg0: i32, %arg1: memref<1x18x128xf32, #tpu.memory_space<vmem>>, %arg2: memref<3x128x128xf32, #tpu.memory_space<vmem>>, %arg3: memref<1x128xf32, #tpu.memory_space<vmem>>, %arg4: memref<1x18x128xf32, #tpu.memory_space<vmem>>, %arg5: memref<1x2x128xf32, #tpu.memory_space<vmem>>) attributes {dimension_semantics = [#tpu.dimension_semantics<parallel>], iteration_bounds = array<i64: 2>, scalar_prefetch = 0 : i64, scratch_operands = 0 : i64, tpu.core_type = #tpu.core_type<tc>, window_params = [{transform_indices = @transform_0, window_bounds = array<i64: 1, 18, 128>}, {pipeline_mode = #tpu.pipeline_mode<synchronous>, transform_indices = @transform_1, window_bounds = array<i64: 3, 128, 128>}, {pipeline_mode = #tpu.pipeline_mode<synchronous>, transform_indices = @transform_2, window_bounds = array<i64: 1, 128>}, {transform_indices = @transform_3, window_bounds = array<i64: 1, 18, 128>}, {transform_indices = @transform_4, window_bounds = array<i64: 1, 2, 128>}]} {
    %c0 = arith.constant 0 : index
    %c0_0 = arith.constant 0 : index
    %c0_1 = arith.constant 0 : index
    %0 = vector.load %arg1[%c0, %c0_0, %c0_1] : memref<1x18x128xf32, #tpu.memory_space<vmem>>, vector<1x18x128xf32>
    %1 = vector.shape_cast %0 : vector<1x18x128xf32> to vector<18x128xf32>
    %2 = vector.extract_strided_slice %1 {offsets = [0, 0], sizes = [16, 128], strides = [1, 1]} : vector<18x128xf32> to vector<16x128xf32>
    %c0_2 = arith.constant 0 : index
    %c0_3 = arith.constant 0 : index
    %c0_4 = arith.constant 0 : index
    %3 = vector.load %arg2[%c0_2, %c0_3, %c0_4] : memref<3x128x128xf32, #tpu.memory_space<vmem>>, vector<1x128x128xf32>
    %4 = vector.shape_cast %3 : vector<1x128x128xf32> to vector<128x128xf32>
    %cst = arith.constant dense<0.000000e+00> : vector<16x128xf32>
    %5 = tpu.matmul %2, %4, %cst {dimension_numbers = #tpu.dot_dimension_numbers<[1], [0], [0], [1], [0, 0, 1, 1], [], []>} : vector<16x128xf32>, vector<128x128xf32>, vector<16x128xf32> -> vector<16x128xf32>
    %6 = vector.extract_strided_slice %1 {offsets = [1, 0], sizes = [16, 128], strides = [1, 1]} : vector<18x128xf32> to vector<16x128xf32>
    %c1 = arith.constant 1 : index
    %c0_5 = arith.constant 0 : index
    %c0_6 = arith.constant 0 : index
    %7 = vector.load %arg2[%c1, %c0_5, %c0_6] : memref<3x128x128xf32, #tpu.memory_space<vmem>>, vector<1x128x128xf32>
    %8 = vector.shape_cast %7 : vector<1x128x128xf32> to vector<128x128xf32>
    %cst_7 = arith.constant dense<0.000000e+00> : vector<16x128xf32>
    %9 = tpu.matmul %6, %8, %cst_7 {dimension_numbers = #tpu.dot_dimension_numbers<[1], [0], [0], [1], [0, 0, 1, 1], [], []>} : vector<16x128xf32>, vector<128x128xf32>, vector<16x128xf32> -> vector<16x128xf32>
    %10 = arith.addf %5, %9 : vector<16x128xf32>
    %11 = vector.extract_strided_slice %1 {offsets = [2, 0], sizes = [16, 128], strides = [1, 1]} : vector<18x128xf32> to vector<16x128xf32>
    %c2 = arith.constant 2 : index
    %c0_8 = arith.constant 0 : index
    %c0_9 = arith.constant 0 : index
    %12 = vector.load %arg2[%c2, %c0_8, %c0_9] : memref<3x128x128xf32, #tpu.memory_space<vmem>>, vector<1x128x128xf32>
    %13 = vector.shape_cast %12 : vector<1x128x128xf32> to vector<128x128xf32>
    %cst_10 = arith.constant dense<0.000000e+00> : vector<16x128xf32>
    %14 = tpu.matmul %11, %13, %cst_10 {dimension_numbers = #tpu.dot_dimension_numbers<[1], [0], [0], [1], [0, 0, 1, 1], [], []>} : vector<16x128xf32>, vector<128x128xf32>, vector<16x128xf32> -> vector<16x128xf32>
    %15 = arith.addf %10, %14 : vector<16x128xf32>
    %c0_11 = arith.constant 0 : index
    %c0_12 = arith.constant 0 : index
    %16 = vector.load %arg3[%c0_11, %c0_12] : memref<1x128xf32, #tpu.memory_space<vmem>>, vector<1x128xf32>
    %17 = vector.broadcast %16 : vector<1x128xf32> to vector<16x128xf32>
    %18 = arith.addf %15, %17 : vector<16x128xf32>
    %cst_13 = arith.constant 0.000000e+00 : f32
    %19 = vector.broadcast %cst_13 : f32 to vector<1x128xf32>
    %c0_14 = arith.constant 0 : index
    %c0_15 = arith.constant 0 : index
    %c0_16 = arith.constant 0 : index
    %20 = vector.load %arg4[%c0_14, %c0_15, %c0_16] : memref<1x18x128xf32, #tpu.memory_space<vmem>>, vector<1x1x128xf32>
    %21 = vector.shape_cast %20 : vector<1x1x128xf32> to vector<1x128xf32>
    %22 = vector.shape_cast %19 : vector<1x128xf32> to vector<1x1x128xf32>
    tpu.vector_store %arg4[%c0_14, %c0_15, %c0_16], %22 {strides = array<i32>} : memref<1x18x128xf32, #tpu.memory_space<vmem>>, vector<1x1x128xf32>,
    %cst_17 = arith.constant 0.000000e+00 : f32
    %23 = vector.broadcast %cst_17 : f32 to vector<1x128xf32>
    %c0_18 = arith.constant 0 : index
    %c17 = arith.constant 17 : index
    %c0_19 = arith.constant 0 : index
    %24 = vector.load %arg4[%c0_18, %c17, %c0_19] : memref<1x18x128xf32, #tpu.memory_space<vmem>>, vector<1x1x128xf32>
    %25 = vector.shape_cast %24 : vector<1x1x128xf32> to vector<1x128xf32>
    %26 = vector.shape_cast %23 : vector<1x128xf32> to vector<1x1x128xf32>
    tpu.vector_store %arg4[%c0_18, %c17, %c0_19], %26 {strides = array<i32>} : memref<1x18x128xf32, #tpu.memory_space<vmem>>, vector<1x1x128xf32>,
    %c0_20 = arith.constant 0 : index
    %c1_21 = arith.constant 1 : index
    %c0_22 = arith.constant 0 : index
    %27 = vector.load %arg4[%c0_20, %c1_21, %c0_22] : memref<1x18x128xf32, #tpu.memory_space<vmem>>, vector<1x16x128xf32>
    %28 = vector.shape_cast %27 : vector<1x16x128xf32> to vector<16x128xf32>
    %29 = vector.shape_cast %18 : vector<16x128xf32> to vector<1x16x128xf32>
    tpu.vector_store %arg4[%c0_20, %c1_21, %c0_22], %29 {strides = array<i32>} : memref<1x18x128xf32, #tpu.memory_space<vmem>>, vector<1x16x128xf32>,
    %cst_23 = arith.constant dense<0.000000e+00> : vector<128xf32>
    %30 = vector.multi_reduction <add>, %18, %cst_23 [0] : vector<16x128xf32> to vector<128xf32>
    %31 = vector.shape_cast %30 : vector<128xf32> to vector<1x128xf32>
    %c0_24 = arith.constant 0 : index
    %c0_25 = arith.constant 0 : index
    %c0_26 = arith.constant 0 : index
    %32 = vector.load %arg5[%c0_24, %c0_25, %c0_26] : memref<1x2x128xf32, #tpu.memory_space<vmem>>, vector<1x1x128xf32>
    %33 = vector.shape_cast %32 : vector<1x1x128xf32> to vector<1x128xf32>
    %34 = vector.shape_cast %31 : vector<1x128xf32> to vector<1x1x128xf32>
    tpu.vector_store %arg5[%c0_24, %c0_25, %c0_26], %34 {strides = array<i32>} : memref<1x2x128xf32, #tpu.memory_space<vmem>>, vector<1x1x128xf32>,
    %35 = arith.mulf %18, %18 : vector<16x128xf32>
    %cst_27 = arith.constant dense<0.000000e+00> : vector<128xf32>
    %36 = vector.multi_reduction <add>, %35, %cst_27 [0] : vector<16x128xf32> to vector<128xf32>
    %37 = vector.shape_cast %36 : vector<128xf32> to vector<1x128xf32>
    %c0_28 = arith.constant 0 : index
    %c1_29 = arith.constant 1 : index
    %c0_30 = arith.constant 0 : index
    %38 = vector.load %arg5[%c0_28, %c1_29, %c0_30] : memref<1x2x128xf32, #tpu.memory_space<vmem>>, vector<1x1x128xf32>
    %39 = vector.shape_cast %38 : vector<1x1x128xf32> to vector<1x128xf32>
    %40 = vector.shape_cast %37 : vector<1x128xf32> to vector<1x1x128xf32>
    tpu.vector_store %arg5[%c0_28, %c1_29, %c0_30], %40 {strides = array<i32>} : memref<1x2x128xf32, #tpu.memory_space<vmem>>, vector<1x1x128xf32>,
    return
  }
  func.func @transform_0(%arg0: i32) -> (i32, i32, i32) {
    %c0_i32 = arith.constant 0 : i32
    %c0_i32_0 = arith.constant 0 : i32
    %c0_i32_1 = arith.constant 0 : i32
    return %arg0, %c0_i32, %c0_i32_0 : i32, i32, i32
  }
  func.func @transform_1(%arg0: i32) -> (i32, i32, i32) {
    %c0_i32 = arith.constant 0 : i32
    %c0_i32_0 = arith.constant 0 : i32
    %c0_i32_1 = arith.constant 0 : i32
    %c0_i32_2 = arith.constant 0 : i32
    return %c0_i32, %c0_i32_0, %c0_i32_1 : i32, i32, i32
  }
  func.func @transform_2(%arg0: i32) -> (i32, i32) {
    %c0_i32 = arith.constant 0 : i32
    %c0_i32_0 = arith.constant 0 : i32
    %c0_i32_1 = arith.constant 0 : i32
    return %c0_i32, %c0_i32_0 : i32, i32
  }
  func.func @transform_3(%arg0: i32) -> (i32, i32, i32) {
    %c0_i32 = arith.constant 0 : i32
    %c0_i32_0 = arith.constant 0 : i32
    %c0_i32_1 = arith.constant 0 : i32
    return %arg0, %c0_i32, %c0_i32_0 : i32, i32, i32
  }
  func.func @transform_4(%arg0: i32) -> (i32, i32, i32) {
    %c0_i32 = arith.constant 0 : i32
    %c0_i32_0 = arith.constant 0 : i32
    %c0_i32_1 = arith.constant 0 : i32
    return %arg0, %c0_i32, %c0_i32_0 : i32, i32, i32
  }
}

module attributes {stable_mosaic.version = 11 : i64} {
  func.func @kernel(%arg0: i32, %arg1: memref<1x18x128xf32, #tpu.memory_space<vmem>>, %arg2: memref<1x128xf32, #tpu.memory_space<vmem>>, %arg3: memref<1x128xf32, #tpu.memory_space<vmem>>, %arg4: memref<3x128x128xf32, #tpu.memory_space<vmem>>, %arg5: memref<1x128xf32, #tpu.memory_space<vmem>>, %arg6: memref<1x18x128xf32, #tpu.memory_space<vmem>>, %arg7: memref<1x2x128xf32, #tpu.memory_space<vmem>>) attributes {dimension_semantics = [#tpu.dimension_semantics<parallel>], iteration_bounds = array<i64: 2>, scalar_prefetch = 0 : i64, scratch_operands = 0 : i64, tpu.core_type = #tpu.core_type<tc>, window_params = [{transform_indices = @transform_0, window_bounds = array<i64: 1, 18, 128>}, {pipeline_mode = #tpu.pipeline_mode<synchronous>, transform_indices = @transform_1, window_bounds = array<i64: 1, 128>}, {pipeline_mode = #tpu.pipeline_mode<synchronous>, transform_indices = @transform_2, window_bounds = array<i64: 1, 128>}, {pipeline_mode = #tpu.pipeline_mode<synchronous>, transform_indices = @transform_3, window_bounds = array<i64: 3, 128, 128>}, {pipeline_mode = #tpu.pipeline_mode<synchronous>, transform_indices = @transform_4, window_bounds = array<i64: 1, 128>}, {transform_indices = @transform_5, window_bounds = array<i64: 1, 18, 128>}, {transform_indices = @transform_6, window_bounds = array<i64: 1, 2, 128>}]} {
    %c0 = arith.constant 0 : index
    %c0_0 = arith.constant 0 : index
    %c0_1 = arith.constant 0 : index
    %0 = vector.load %arg1[%c0, %c0_0, %c0_1] : memref<1x18x128xf32, #tpu.memory_space<vmem>>, vector<1x18x128xf32>
    %1 = vector.shape_cast %0 : vector<1x18x128xf32> to vector<18x128xf32>
    %2 = tpu.iota {dimensions = array<i32: 0>} : vector<18x1xi32>
    %c1_i32 = arith.constant 1 : i32
    %3 = vector.broadcast %c1_i32 : i32 to vector<18x1xi32>
    %4 = arith.cmpi sge, %2, %3 : vector<18x1xi32>
    %c16_i32 = arith.constant 16 : i32
    %5 = vector.broadcast %c16_i32 : i32 to vector<18x1xi32>
    %6 = arith.cmpi sle, %2, %5 : vector<18x1xi32>
    %7 = arith.andi %4, %6 : vector<18x1xi1>
    %c0_2 = arith.constant 0 : index
    %c0_3 = arith.constant 0 : index
    %8 = vector.load %arg2[%c0_2, %c0_3] : memref<1x128xf32, #tpu.memory_space<vmem>>, vector<1x128xf32>
    %9 = vector.broadcast %8 : vector<1x128xf32> to vector<18x128xf32>
    %10 = arith.mulf %1, %9 : vector<18x128xf32>
    %c0_4 = arith.constant 0 : index
    %c0_5 = arith.constant 0 : index
    %11 = vector.load %arg3[%c0_4, %c0_5] : memref<1x128xf32, #tpu.memory_space<vmem>>, vector<1x128xf32>
    %12 = vector.broadcast %11 : vector<1x128xf32> to vector<18x128xf32>
    %13 = arith.addf %10, %12 : vector<18x128xf32>
    %cst = arith.constant 0.000000e+00 : f32
    %14 = vector.broadcast %cst : f32 to vector<18x128xf32>
    %15 = arith.maximumf %13, %14 : vector<18x128xf32>
    %cst_6 = arith.constant 0.000000e+00 : f32
    %16 = vector.shape_cast %7 : vector<18x1xi1> to vector<18x1xi1>
    %17 = vector.broadcast %16 : vector<18x1xi1> to vector<18x128xi1>
    %18 = vector.broadcast %cst_6 : f32 to vector<18x128xf32>
    %19 = arith.select %17, %15, %18 : vector<18x128xi1>, vector<18x128xf32>
    %20 = vector.extract_strided_slice %19 {offsets = [0, 0], sizes = [16, 128], strides = [1, 1]} : vector<18x128xf32> to vector<16x128xf32>
    %c0_7 = arith.constant 0 : index
    %c0_8 = arith.constant 0 : index
    %c0_9 = arith.constant 0 : index
    %21 = vector.load %arg4[%c0_7, %c0_8, %c0_9] : memref<3x128x128xf32, #tpu.memory_space<vmem>>, vector<1x128x128xf32>
    %22 = vector.shape_cast %21 : vector<1x128x128xf32> to vector<128x128xf32>
    %cst_10 = arith.constant dense<0.000000e+00> : vector<16x128xf32>
    %23 = tpu.matmul %20, %22, %cst_10 {dimension_numbers = #tpu.dot_dimension_numbers<[1], [0], [0], [1], [0, 0, 1, 1], [], []>} : vector<16x128xf32>, vector<128x128xf32>, vector<16x128xf32> -> vector<16x128xf32>
    %24 = vector.extract_strided_slice %19 {offsets = [1, 0], sizes = [16, 128], strides = [1, 1]} : vector<18x128xf32> to vector<16x128xf32>
    %c1 = arith.constant 1 : index
    %c0_11 = arith.constant 0 : index
    %c0_12 = arith.constant 0 : index
    %25 = vector.load %arg4[%c1, %c0_11, %c0_12] : memref<3x128x128xf32, #tpu.memory_space<vmem>>, vector<1x128x128xf32>
    %26 = vector.shape_cast %25 : vector<1x128x128xf32> to vector<128x128xf32>
    %cst_13 = arith.constant dense<0.000000e+00> : vector<16x128xf32>
    %27 = tpu.matmul %24, %26, %cst_13 {dimension_numbers = #tpu.dot_dimension_numbers<[1], [0], [0], [1], [0, 0, 1, 1], [], []>} : vector<16x128xf32>, vector<128x128xf32>, vector<16x128xf32> -> vector<16x128xf32>
    %28 = arith.addf %23, %27 : vector<16x128xf32>
    %29 = vector.extract_strided_slice %19 {offsets = [2, 0], sizes = [16, 128], strides = [1, 1]} : vector<18x128xf32> to vector<16x128xf32>
    %c2 = arith.constant 2 : index
    %c0_14 = arith.constant 0 : index
    %c0_15 = arith.constant 0 : index
    %30 = vector.load %arg4[%c2, %c0_14, %c0_15] : memref<3x128x128xf32, #tpu.memory_space<vmem>>, vector<1x128x128xf32>
    %31 = vector.shape_cast %30 : vector<1x128x128xf32> to vector<128x128xf32>
    %cst_16 = arith.constant dense<0.000000e+00> : vector<16x128xf32>
    %32 = tpu.matmul %29, %31, %cst_16 {dimension_numbers = #tpu.dot_dimension_numbers<[1], [0], [0], [1], [0, 0, 1, 1], [], []>} : vector<16x128xf32>, vector<128x128xf32>, vector<16x128xf32> -> vector<16x128xf32>
    %33 = arith.addf %28, %32 : vector<16x128xf32>
    %c0_17 = arith.constant 0 : index
    %c0_18 = arith.constant 0 : index
    %34 = vector.load %arg5[%c0_17, %c0_18] : memref<1x128xf32, #tpu.memory_space<vmem>>, vector<1x128xf32>
    %35 = vector.broadcast %34 : vector<1x128xf32> to vector<16x128xf32>
    %36 = arith.addf %33, %35 : vector<16x128xf32>
    %cst_19 = arith.constant 0.000000e+00 : f32
    %37 = vector.broadcast %cst_19 : f32 to vector<1x128xf32>
    %c0_20 = arith.constant 0 : index
    %c0_21 = arith.constant 0 : index
    %c0_22 = arith.constant 0 : index
    %38 = vector.load %arg6[%c0_20, %c0_21, %c0_22] : memref<1x18x128xf32, #tpu.memory_space<vmem>>, vector<1x1x128xf32>
    %39 = vector.shape_cast %38 : vector<1x1x128xf32> to vector<1x128xf32>
    %40 = vector.shape_cast %37 : vector<1x128xf32> to vector<1x1x128xf32>
    tpu.vector_store %arg6[%c0_20, %c0_21, %c0_22], %40 {strides = array<i32>} : memref<1x18x128xf32, #tpu.memory_space<vmem>>, vector<1x1x128xf32>,
    %cst_23 = arith.constant 0.000000e+00 : f32
    %41 = vector.broadcast %cst_23 : f32 to vector<1x128xf32>
    %c0_24 = arith.constant 0 : index
    %c17 = arith.constant 17 : index
    %c0_25 = arith.constant 0 : index
    %42 = vector.load %arg6[%c0_24, %c17, %c0_25] : memref<1x18x128xf32, #tpu.memory_space<vmem>>, vector<1x1x128xf32>
    %43 = vector.shape_cast %42 : vector<1x1x128xf32> to vector<1x128xf32>
    %44 = vector.shape_cast %41 : vector<1x128xf32> to vector<1x1x128xf32>
    tpu.vector_store %arg6[%c0_24, %c17, %c0_25], %44 {strides = array<i32>} : memref<1x18x128xf32, #tpu.memory_space<vmem>>, vector<1x1x128xf32>,
    %c0_26 = arith.constant 0 : index
    %c1_27 = arith.constant 1 : index
    %c0_28 = arith.constant 0 : index
    %45 = vector.load %arg6[%c0_26, %c1_27, %c0_28] : memref<1x18x128xf32, #tpu.memory_space<vmem>>, vector<1x16x128xf32>
    %46 = vector.shape_cast %45 : vector<1x16x128xf32> to vector<16x128xf32>
    %47 = vector.shape_cast %36 : vector<16x128xf32> to vector<1x16x128xf32>
    tpu.vector_store %arg6[%c0_26, %c1_27, %c0_28], %47 {strides = array<i32>} : memref<1x18x128xf32, #tpu.memory_space<vmem>>, vector<1x16x128xf32>,
    %cst_29 = arith.constant dense<0.000000e+00> : vector<128xf32>
    %48 = vector.multi_reduction <add>, %36, %cst_29 [0] : vector<16x128xf32> to vector<128xf32>
    %49 = vector.shape_cast %48 : vector<128xf32> to vector<1x128xf32>
    %c0_30 = arith.constant 0 : index
    %c0_31 = arith.constant 0 : index
    %c0_32 = arith.constant 0 : index
    %50 = vector.load %arg7[%c0_30, %c0_31, %c0_32] : memref<1x2x128xf32, #tpu.memory_space<vmem>>, vector<1x1x128xf32>
    %51 = vector.shape_cast %50 : vector<1x1x128xf32> to vector<1x128xf32>
    %52 = vector.shape_cast %49 : vector<1x128xf32> to vector<1x1x128xf32>
    tpu.vector_store %arg7[%c0_30, %c0_31, %c0_32], %52 {strides = array<i32>} : memref<1x2x128xf32, #tpu.memory_space<vmem>>, vector<1x1x128xf32>,
    %53 = arith.mulf %36, %36 : vector<16x128xf32>
    %cst_33 = arith.constant dense<0.000000e+00> : vector<128xf32>
    %54 = vector.multi_reduction <add>, %53, %cst_33 [0] : vector<16x128xf32> to vector<128xf32>
    %55 = vector.shape_cast %54 : vector<128xf32> to vector<1x128xf32>
    %c0_34 = arith.constant 0 : index
    %c1_35 = arith.constant 1 : index
    %c0_36 = arith.constant 0 : index
    %56 = vector.load %arg7[%c0_34, %c1_35, %c0_36] : memref<1x2x128xf32, #tpu.memory_space<vmem>>, vector<1x1x128xf32>
    %57 = vector.shape_cast %56 : vector<1x1x128xf32> to vector<1x128xf32>
    %58 = vector.shape_cast %55 : vector<1x128xf32> to vector<1x1x128xf32>
    tpu.vector_store %arg7[%c0_34, %c1_35, %c0_36], %58 {strides = array<i32>} : memref<1x2x128xf32, #tpu.memory_space<vmem>>, vector<1x1x128xf32>,
    return
  }
  func.func @transform_0(%arg0: i32) -> (i32, i32, i32) {
    %c0_i32 = arith.constant 0 : i32
    %c0_i32_0 = arith.constant 0 : i32
    %c0_i32_1 = arith.constant 0 : i32
    return %arg0, %c0_i32, %c0_i32_0 : i32, i32, i32
  }
  func.func @transform_1(%arg0: i32) -> (i32, i32) {
    %c0_i32 = arith.constant 0 : i32
    %c0_i32_0 = arith.constant 0 : i32
    %c0_i32_1 = arith.constant 0 : i32
    return %c0_i32, %c0_i32_0 : i32, i32
  }
  func.func @transform_2(%arg0: i32) -> (i32, i32) {
    %c0_i32 = arith.constant 0 : i32
    %c0_i32_0 = arith.constant 0 : i32
    %c0_i32_1 = arith.constant 0 : i32
    return %c0_i32, %c0_i32_0 : i32, i32
  }
  func.func @transform_3(%arg0: i32) -> (i32, i32, i32) {
    %c0_i32 = arith.constant 0 : i32
    %c0_i32_0 = arith.constant 0 : i32
    %c0_i32_1 = arith.constant 0 : i32
    %c0_i32_2 = arith.constant 0 : i32
    return %c0_i32, %c0_i32_0, %c0_i32_1 : i32, i32, i32
  }
  func.func @transform_4(%arg0: i32) -> (i32, i32) {
    %c0_i32 = arith.constant 0 : i32
    %c0_i32_0 = arith.constant 0 : i32
    %c0_i32_1 = arith.constant 0 : i32
    return %c0_i32, %c0_i32_0 : i32, i32
  }
  func.func @transform_5(%arg0: i32) -> (i32, i32, i32) {
    %c0_i32 = arith.constant 0 : i32
    %c0_i32_0 = arith.constant 0 : i32
    %c0_i32_1 = arith.constant 0 : i32
    return %arg0, %c0_i32, %c0_i32_0 : i32, i32, i32
  }
  func.func @transform_6(%arg0: i32) -> (i32, i32, i32) {
    %c0_i32 = arith.constant 0 : i32
    %c0_i32_0 = arith.constant 0 : i32
    %c0_i32_1 = arith.constant 0 : i32
    return %arg0, %c0_i32, %c0_i32_0 : i32, i32, i32
  }
}

module attributes {stable_mosaic.version = 11 : i64} {
  func.func @kernel(%arg0: i32, %arg1: memref<1x18x128xf32, #tpu.memory_space<vmem>>, %arg2: memref<1x128xf32, #tpu.memory_space<vmem>>, %arg3: memref<1x128xf32, #tpu.memory_space<vmem>>, %arg4: memref<2x2x128x128xf32, #tpu.memory_space<vmem>>, %arg5: memref<1x128xf32, #tpu.memory_space<vmem>>, %arg6: memref<1x2x16x128xf32, #tpu.memory_space<vmem>>) attributes {dimension_semantics = [#tpu.dimension_semantics<parallel>], iteration_bounds = array<i64: 2>, scalar_prefetch = 0 : i64, scratch_operands = 0 : i64, tpu.core_type = #tpu.core_type<tc>, window_params = [{transform_indices = @transform_0, window_bounds = array<i64: 1, 18, 128>}, {pipeline_mode = #tpu.pipeline_mode<synchronous>, transform_indices = @transform_1, window_bounds = array<i64: 1, 128>}, {pipeline_mode = #tpu.pipeline_mode<synchronous>, transform_indices = @transform_2, window_bounds = array<i64: 1, 128>}, {pipeline_mode = #tpu.pipeline_mode<synchronous>, transform_indices = @transform_3, window_bounds = array<i64: 2, 2, 128, 128>}, {pipeline_mode = #tpu.pipeline_mode<synchronous>, transform_indices = @transform_4, window_bounds = array<i64: 1, 128>}, {transform_indices = @transform_5, window_bounds = array<i64: 1, 2, 16, 128>}]} {
    %0 = tpu.iota {dimensions = array<i32: 0>} : vector<18x1xi32>
    %c1_i32 = arith.constant 1 : i32
    %1 = vector.broadcast %c1_i32 : i32 to vector<18x1xi32>
    %2 = arith.cmpi sge, %0, %1 : vector<18x1xi32>
    %c16_i32 = arith.constant 16 : i32
    %3 = vector.broadcast %c16_i32 : i32 to vector<18x1xi32>
    %4 = arith.cmpi sle, %0, %3 : vector<18x1xi32>
    %5 = arith.andi %2, %4 : vector<18x1xi1>
    %c0 = arith.constant 0 : index
    %c0_0 = arith.constant 0 : index
    %c0_1 = arith.constant 0 : index
    %6 = vector.load %arg1[%c0, %c0_0, %c0_1] : memref<1x18x128xf32, #tpu.memory_space<vmem>>, vector<1x18x128xf32>
    %7 = vector.shape_cast %6 : vector<1x18x128xf32> to vector<18x128xf32>
    %c0_2 = arith.constant 0 : index
    %c0_3 = arith.constant 0 : index
    %8 = vector.load %arg2[%c0_2, %c0_3] : memref<1x128xf32, #tpu.memory_space<vmem>>, vector<1x128xf32>
    %9 = vector.broadcast %8 : vector<1x128xf32> to vector<18x128xf32>
    %10 = arith.mulf %7, %9 : vector<18x128xf32>
    %c0_4 = arith.constant 0 : index
    %c0_5 = arith.constant 0 : index
    %11 = vector.load %arg3[%c0_4, %c0_5] : memref<1x128xf32, #tpu.memory_space<vmem>>, vector<1x128xf32>
    %12 = vector.broadcast %11 : vector<1x128xf32> to vector<18x128xf32>
    %13 = arith.addf %10, %12 : vector<18x128xf32>
    %cst = arith.constant 0.000000e+00 : f32
    %14 = vector.broadcast %cst : f32 to vector<18x128xf32>
    %15 = arith.maximumf %13, %14 : vector<18x128xf32>
    %cst_6 = arith.constant 0.000000e+00 : f32
    %16 = vector.shape_cast %5 : vector<18x1xi1> to vector<18x1xi1>
    %17 = vector.broadcast %16 : vector<18x1xi1> to vector<18x128xi1>
    %18 = vector.broadcast %cst_6 : f32 to vector<18x128xf32>
    %19 = arith.select %17, %15, %18 : vector<18x128xi1>, vector<18x128xf32>
    %20 = vector.extract_strided_slice %19 {offsets = [0, 0], sizes = [16, 128], strides = [1, 1]} : vector<18x128xf32> to vector<16x128xf32>
    %c0_7 = arith.constant 0 : index
    %c0_8 = arith.constant 0 : index
    %c0_9 = arith.constant 0 : index
    %c0_10 = arith.constant 0 : index
    %21 = vector.load %arg4[%c0_7, %c0_8, %c0_9, %c0_10] : memref<2x2x128x128xf32, #tpu.memory_space<vmem>>, vector<1x1x128x128xf32>
    %22 = vector.shape_cast %21 : vector<1x1x128x128xf32> to vector<128x128xf32>
    %cst_11 = arith.constant dense<0.000000e+00> : vector<16x128xf32>
    %23 = tpu.matmul %20, %22, %cst_11 {dimension_numbers = #tpu.dot_dimension_numbers<[1], [0], [0], [1], [0, 0, 1, 1], [], []>} : vector<16x128xf32>, vector<128x128xf32>, vector<16x128xf32> -> vector<16x128xf32>
    %24 = vector.extract_strided_slice %19 {offsets = [1, 0], sizes = [16, 128], strides = [1, 1]} : vector<18x128xf32> to vector<16x128xf32>
    %c0_12 = arith.constant 0 : index
    %c1 = arith.constant 1 : index
    %c0_13 = arith.constant 0 : index
    %c0_14 = arith.constant 0 : index
    %25 = vector.load %arg4[%c0_12, %c1, %c0_13, %c0_14] : memref<2x2x128x128xf32, #tpu.memory_space<vmem>>, vector<1x1x128x128xf32>
    %26 = vector.shape_cast %25 : vector<1x1x128x128xf32> to vector<128x128xf32>
    %cst_15 = arith.constant dense<0.000000e+00> : vector<16x128xf32>
    %27 = tpu.matmul %24, %26, %cst_15 {dimension_numbers = #tpu.dot_dimension_numbers<[1], [0], [0], [1], [0, 0, 1, 1], [], []>} : vector<16x128xf32>, vector<128x128xf32>, vector<16x128xf32> -> vector<16x128xf32>
    %28 = arith.addf %23, %27 : vector<16x128xf32>
    %c0_16 = arith.constant 0 : index
    %c0_17 = arith.constant 0 : index
    %29 = vector.load %arg5[%c0_16, %c0_17] : memref<1x128xf32, #tpu.memory_space<vmem>>, vector<1x128xf32>
    %30 = vector.broadcast %29 : vector<1x128xf32> to vector<16x128xf32>
    %31 = arith.addf %28, %30 : vector<16x128xf32>
    %c0_18 = arith.constant 0 : index
    %c0_19 = arith.constant 0 : index
    %c0_20 = arith.constant 0 : index
    %c0_21 = arith.constant 0 : index
    %32 = vector.load %arg6[%c0_18, %c0_19, %c0_20, %c0_21] : memref<1x2x16x128xf32, #tpu.memory_space<vmem>>, vector<1x1x16x128xf32>
    %33 = vector.shape_cast %32 : vector<1x1x16x128xf32> to vector<16x128xf32>
    %34 = vector.shape_cast %31 : vector<16x128xf32> to vector<1x1x16x128xf32>
    tpu.vector_store %arg6[%c0_18, %c0_19, %c0_20, %c0_21], %34 {strides = array<i32>} : memref<1x2x16x128xf32, #tpu.memory_space<vmem>>, vector<1x1x16x128xf32>,
    %35 = vector.extract_strided_slice %19 {offsets = [1, 0], sizes = [16, 128], strides = [1, 1]} : vector<18x128xf32> to vector<16x128xf32>
    %c1_22 = arith.constant 1 : index
    %c0_23 = arith.constant 0 : index
    %c0_24 = arith.constant 0 : index
    %c0_25 = arith.constant 0 : index
    %36 = vector.load %arg4[%c1_22, %c0_23, %c0_24, %c0_25] : memref<2x2x128x128xf32, #tpu.memory_space<vmem>>, vector<1x1x128x128xf32>
    %37 = vector.shape_cast %36 : vector<1x1x128x128xf32> to vector<128x128xf32>
    %cst_26 = arith.constant dense<0.000000e+00> : vector<16x128xf32>
    %38 = tpu.matmul %35, %37, %cst_26 {dimension_numbers = #tpu.dot_dimension_numbers<[1], [0], [0], [1], [0, 0, 1, 1], [], []>} : vector<16x128xf32>, vector<128x128xf32>, vector<16x128xf32> -> vector<16x128xf32>
    %39 = vector.extract_strided_slice %19 {offsets = [2, 0], sizes = [16, 128], strides = [1, 1]} : vector<18x128xf32> to vector<16x128xf32>
    %c1_27 = arith.constant 1 : index
    %c1_28 = arith.constant 1 : index
    %c0_29 = arith.constant 0 : index
    %c0_30 = arith.constant 0 : index
    %40 = vector.load %arg4[%c1_27, %c1_28, %c0_29, %c0_30] : memref<2x2x128x128xf32, #tpu.memory_space<vmem>>, vector<1x1x128x128xf32>
    %41 = vector.shape_cast %40 : vector<1x1x128x128xf32> to vector<128x128xf32>
    %cst_31 = arith.constant dense<0.000000e+00> : vector<16x128xf32>
    %42 = tpu.matmul %39, %41, %cst_31 {dimension_numbers = #tpu.dot_dimension_numbers<[1], [0], [0], [1], [0, 0, 1, 1], [], []>} : vector<16x128xf32>, vector<128x128xf32>, vector<16x128xf32> -> vector<16x128xf32>
    %43 = arith.addf %38, %42 : vector<16x128xf32>
    %c0_32 = arith.constant 0 : index
    %c0_33 = arith.constant 0 : index
    %44 = vector.load %arg5[%c0_32, %c0_33] : memref<1x128xf32, #tpu.memory_space<vmem>>, vector<1x128xf32>
    %45 = vector.broadcast %44 : vector<1x128xf32> to vector<16x128xf32>
    %46 = arith.addf %43, %45 : vector<16x128xf32>
    %c0_34 = arith.constant 0 : index
    %c1_35 = arith.constant 1 : index
    %c0_36 = arith.constant 0 : index
    %c0_37 = arith.constant 0 : index
    %47 = vector.load %arg6[%c0_34, %c1_35, %c0_36, %c0_37] : memref<1x2x16x128xf32, #tpu.memory_space<vmem>>, vector<1x1x16x128xf32>
    %48 = vector.shape_cast %47 : vector<1x1x16x128xf32> to vector<16x128xf32>
    %49 = vector.shape_cast %46 : vector<16x128xf32> to vector<1x1x16x128xf32>
    tpu.vector_store %arg6[%c0_34, %c1_35, %c0_36, %c0_37], %49 {strides = array<i32>} : memref<1x2x16x128xf32, #tpu.memory_space<vmem>>, vector<1x1x16x128xf32>,
    return
  }
  func.func @transform_0(%arg0: i32) -> (i32, i32, i32) {
    %c0_i32 = arith.constant 0 : i32
    %c0_i32_0 = arith.constant 0 : i32
    %c0_i32_1 = arith.constant 0 : i32
    return %arg0, %c0_i32, %c0_i32_0 : i32, i32, i32
  }
  func.func @transform_1(%arg0: i32) -> (i32, i32) {
    %c0_i32 = arith.constant 0 : i32
    %c0_i32_0 = arith.constant 0 : i32
    %c0_i32_1 = arith.constant 0 : i32
    return %c0_i32, %c0_i32_0 : i32, i32
  }
  func.func @transform_2(%arg0: i32) -> (i32, i32) {
    %c0_i32 = arith.constant 0 : i32
    %c0_i32_0 = arith.constant 0 : i32
    %c0_i32_1 = arith.constant 0 : i32
    return %c0_i32, %c0_i32_0 : i32, i32
  }
  func.func @transform_3(%arg0: i32) -> (i32, i32, i32, i32) {
    %c0_i32 = arith.constant 0 : i32
    %c0_i32_0 = arith.constant 0 : i32
    %c0_i32_1 = arith.constant 0 : i32
    %c0_i32_2 = arith.constant 0 : i32
    %c0_i32_3 = arith.constant 0 : i32
    return %c0_i32, %c0_i32_0, %c0_i32_1, %c0_i32_2 : i32, i32, i32, i32
  }
  func.func @transform_4(%arg0: i32) -> (i32, i32) {
    %c0_i32 = arith.constant 0 : i32
    %c0_i32_0 = arith.constant 0 : i32
    %c0_i32_1 = arith.constant 0 : i32
    return %c0_i32, %c0_i32_0 : i32, i32
  }
  func.func @transform_5(%arg0: i32) -> (i32, i32, i32, i32) {
    %c0_i32 = arith.constant 0 : i32
    %c0_i32_0 = arith.constant 0 : i32
    %c0_i32_1 = arith.constant 0 : i32
    %c0_i32_2 = arith.constant 0 : i32
    return %arg0, %c0_i32, %c0_i32_0, %c0_i32_1 : i32, i32, i32, i32
  }
}

</mosaic_0001>

<bundles_post_ra>
// kernel: tile.38
= control target key start
LH: loop header
LB: loop body
LE: loop exit
PB: predicated region body
PF: predicated region fallthrough
CT: control target
= control target key end

     0   :  { %s28_s0 = inlined_call_operand.vmem [shape: f32[8], index: 0, kind: input, shape index: {}]   ;;  %s29_s1 = inlined_call_operand.vmem [shape: f32[16,8], index: 1, kind: output, shape index: {}]  }
   0x1   :  { %v4_v0 = vld [vmem:[%s28_s0] ss:$0 sm:$0xff] }
   0x2   :  { %5 = vst [vmem:[%s29_s1] sm:$0xff] %v4_v0  ;;  %8 = vst [vmem:[%s29_s1 + $0x8] sm:$0xff] %v4_v0 }

// kernel: tile.39
= control target key start
LH: loop header
LB: loop body
LE: loop exit
PB: predicated region body
PF: predicated region fallthrough
CT: control target
= control target key end

     0   :  { %s133_s10 = smov 120   ;;  %s134_s11 = smov 104   ;;  %vm3_vm0 = vcmask 64512   ;;  %vm9_vm1 = vcmask 1048512   ;;  %vm15_vm2 = vcmask 982912   ;;  %vm21_vm3 = vcmask 917312   ;;  %s209_s0 = inlined_call_operand.vmem [shape: f32[16,8], index: 0, kind: input, shape index: {}]   ;;  %s210_s1 = inlined_call_operand.vmem [shape: f32[1,128], index: 1, kind: output, shape index: {}]  }
   0x1   :  { %v103_v0 = vld [vmem:[%s209_s0 + $0xf] sm:$0x1]   ;;  %v105_v1 = vld [vmem:[%s209_s0 + $0xd] sm:$0x1]   ;;  %v104_v2 = vld [vmem:[%s209_s0 + $0xe] sm:$0x1]  }
   0x2   :  { %7 = vrot.lane.b32.xlu0 %v103_v0, %s133_s10  ;;  %19 = vrot.lane.b32.xlu1 %v105_v1, %s134_s11  ;;  %v106_v3 = vld [vmem:[%s209_s0 + $0xc] sm:$0x1]   ;;  %s135_s16 = smov 112   ;;  %s136_s17 = smov 96   ;;  %v107_v4 = vld [vmem:[%s209_s0 + $0xb] sm:$0x1]  }
   0x3   :  { %v108_v5 = vld [vmem:[%s209_s0 + $0xa] sm:$0x1]   ;;  %v2_v6 = vld [vmem:[%s209_s0] sm:$0x1]   ;;  %s137_s24 = smov 88   ;;  %s138_s25 = smov 80  }
   0x4   :  { %4 = vst.msk [vmem:[#allocation0] sm:$0x1] %vm3_vm0, %v2_v6   ;;  %v109_v7 = vld [vmem:[%s209_s0 + $0x9] sm:$0x1]   ;;  %v110_v8 = vld [vmem:[%s209_s0 + $0x8] sm:$0x1]  }
   0x5   :  { %s139_s30 = smov 72   ;;  %s140_s2 = smov 64   ;;  %v111_v9 = vld [vmem:[%s209_s0 + $0x7] sm:$0x1]   ;;  %v112_v10 = vld [vmem:[%s209_s0 + $0x6] sm:$0x1]  }
   0x6   :  { %13 = vrot.lane.b32.xlu0 %v104_v2, %s135_s16  ;;  %25 = vrot.lane.b32.xlu1 %v106_v3, %s136_s17  ;;  %s141_s7 = smov 56   ;;  %s142_s8 = smov 48   ;;  %v113_v11 = vld [vmem:[%s209_s0 + $0x5] sm:$0x1]   ;;  %v114_v12 = vld [vmem:[%s209_s0 + $0x4] sm:$0x1]  }
   0x7   :  { %s143_s13 = smov 40   ;;  %s144_s14 = smov 32   ;;  %v115_v13 = vld [vmem:[%s209_s0 + $0x3] sm:$0x1]   ;;  %v116_v14 = vld [vmem:[%s209_s0 + $0x2] sm:$0x1]  }
   0x8   :  { %s145_s19 = smov 24   ;;  %s146_s20 = smov 16   ;;  %v117_v15 = vld [vmem:[%s209_s0 + $0x1] sm:$0x1]   ;;  %vm27_vm4 = vcmask 851712   ;;  %vm33_vm5 = vcmask 786112  }
   0x9   :  { %s147_s0 = smov 8   ;;  %vm39_vm6 = vcmask 720512   ;;  %vm45_vm7 = vcmask 654912   ;;  %vm51_vm8 = vcmask 589312   ;;  %vm57_vm9 = vcmask 523712  }
   0xa   :  { %31 = vrot.lane.b32.xlu0 %v107_v4, %s137_s24  ;;  %37 = vrot.lane.b32.xlu1 %v108_v5, %s138_s25  ;;  %vm63_vm10 = vcmask 458112   ;;  %vm69_vm11 = vcmask 392512   ;;  %vm75_vm12 = vcmask 326912   ;;  %vm81_vm13 = vcmask 261312  }
   0xb   :  { %vm87_vm14 = vcmask 195712   ;;  %vm93_vm15 = vcmask 130112  }
   0xe   :  { %43 = vrot.lane.b32.xlu0 %v109_v7, %s139_s30  ;;  %49 = vrot.lane.b32.xlu1 %v110_v8, %s140_s2 }
  0x12   :  { %55 = vrot.lane.b32.xlu0 %v111_v9, %s141_s7  ;;  %61 = vrot.lane.b32.xlu1 %v112_v10, %s142_s8 }
  0x16   :  { %67 = vrot.lane.b32.xlu0 %v113_v11, %s143_s13  ;;  %73 = vrot.lane.b32.xlu1 %v114_v12, %s144_s14 }
  0x1a   :  { %79 = vrot.lane.b32.xlu0 %v115_v13, %s145_s19  ;;  %85 = vrot.lane.b32.xlu1 %v116_v14, %s146_s20 }
  0x1e   :  { %91 = vrot.lane.b32.xlu0 %v117_v15, %s147_s0 }
  0x74   :  { %v8_v16 = vpop.permute.xlu0 %7   ;;  %v20_v17 = vpop.permute.xlu1 %19  }
  0x75   :  { %10 = vst.msk [vmem:[#allocation0] sm:$0x1] %vm9_vm1, %v8_v16  }
  0x78   :  { %v14_v18 = vpop.permute.xlu0 %13   ;;  %v26_v19 = vpop.permute.xlu1 %25  }
  0x79   :  { %16 = vst.msk [vmem:[#allocation0] sm:$0x1] %vm15_vm2, %v14_v18  }
  0x7a   :  { %22 = vst.msk [vmem:[#allocation0] sm:$0x1] %vm21_vm3, %v20_v17  }
  0x7b   :  { %28 = vst.msk [vmem:[#allocation0] sm:$0x1] %vm27_vm4, %v26_v19  }
  0x7c   :  { %v32_v20 = vpop.permute.xlu0 %31   ;;  %v38_v21 = vpop.permute.xlu1 %37  }
  0x7d   :  { %34 = vst.msk [vmem:[#allocation0] sm:$0x1] %vm33_vm5, %v32_v20  }
  0x7e   :  { %40 = vst.msk [vmem:[#allocation0] sm:$0x1] %vm39_vm6, %v38_v21  }
  0x80   :  { %v44_v22 = vpop.permute.xlu0 %43   ;;  %v50_v23 = vpop.permute.xlu1 %49  }
  0x81   :  { %46 = vst.msk [vmem:[#allocation0] sm:$0x1] %vm45_vm7, %v44_v22  }
  0x82   :  { %52 = vst.msk [vmem:[#allocation0] sm:$0x1] %vm51_vm8, %v50_v23  }
  0x84   :  { %v56_v24 = vpop.permute.xlu0 %55   ;;  %v62_v25 = vpop.permute.xlu1 %61  }
  0x85   :  { %58 = vst.msk [vmem:[#allocation0] sm:$0x1] %vm57_vm9, %v56_v24  }
  0x86   :  { %64 = vst.msk [vmem:[#allocation0] sm:$0x1] %vm63_vm10, %v62_v25  }
  0x88   :  { %v68_v26 = vpop.permute.xlu0 %67   ;;  %v74_v27 = vpop.permute.xlu1 %73  }
  0x89   :  { %70 = vst.msk [vmem:[#allocation0] sm:$0x1] %vm69_vm11, %v68_v26  }
  0x8a   :  { %76 = vst.msk [vmem:[#allocation0] sm:$0x1] %vm75_vm12, %v74_v27  }
  0x8c   :  { %v80_v28 = vpop.permute.xlu0 %79   ;;  %v86_v29 = vpop.permute.xlu1 %85  }
  0x8d   :  { %82 = vst.msk [vmem:[#allocation0] sm:$0x1] %vm81_vm13, %v80_v28  }
  0x8e   :  { %88 = vst.msk [vmem:[#allocation0] sm:$0x1] %vm87_vm14, %v86_v29  }
  0x90   :  { %v92_v30 = vpop.permute.xlu0 %91  }
  0x91   :  { %94 = vst.msk [vmem:[#allocation0] sm:$0x1] %vm93_vm15, %v92_v30  }
  0x98   :  { %v99_v31 = vld [vmem:[#allocation0] sm:$0x1] }
  0x99   :  { %102 = vst [vmem:[%s210_s1] sm:$0x1] %v99_v31 }

// kernel: unet_block_up_forward.3
= control target key start
LH: loop header
LB: loop body
LE: loop exit
PB: predicated region body
PF: predicated region fallthrough
CT: control target
= control target key end

     0   :  { %s871_s15 = smov 0   ;;  %s1067_s0 = inlined_call_operand.vmem [shape: f32[2,18,128], index: 0, kind: input, shape index: {}]   ;;  %s1068_s1 = inlined_call_operand.vmem [shape: f32[3,128,128], index: 1, kind: input, shape index: {}]   ;;  %s1069_s2 = inlined_call_operand.vmem [shape: f32[1,128], index: 2, kind: input, shape index: {}]   ;;  %s1070_s3 = inlined_call_operand.vmem [shape: f32[2,18,128], index: 3, kind: output, shape index: {0}]   ;;  %s1071_s4 = inlined_call_operand.vmem [shape: f32[2,2,128], index: 4, kind: output, shape index: {1}]  }
   0x1 LB: > { %s625_s16 = sadd.s32 4294967295, %s843_s15   ;;  %p629_p0 = scmp.ge.s32.totalorder %s843_s15, 1  ;;  %s843_s15 = sphi %s871_s15, %s15_s15  }
   0x2   : > { %p165_p1 = scmp.lt.s32.totalorder %s843_s15, 3 }
   0x4   : > { %p166_p2 = pnand %p629_p0, %p165_p1 }
   0x5   : > { %p195_p3 = scmp.lt.s32.totalorder (!%p166_p2), %s625_s16, 1 }
   0x6   : > { %169 = sbr.rel (%p166_p2) target bundleno = 294 (0x126), region = 32 }
   0xb   : > { %v648_v0 = vld [vmem:[%s1068_s1 + $0xf8] sm:$0xff]  ;;  %v647_v2 = vld [vmem:[%s1068_s1 + $0xf0] sm:$0xff]  ;;  %v646_v4 = vld [vmem:[%s1068_s1 + $0xe8] sm:$0xff]  ;;  %s1073_s16 = smov (!%p195_p3, %s625_s16), 1  ;;  %vm248_vm0 = vcmask 1046528   ;;  %vm423_vm1 = vcmask 1045504  }
   0xc   : > { %v227_v1 = vld [vmem:[%s1068_s1 + $0x78] sm:$0xff]  ;;  %722 = vmatprep.subr.mxu0 %v648_v0  ;;  %v226_v3 = vld [vmem:[%s1068_s1 + $0x70] sm:$0xff]  ;;  %v225_v5 = vld [vmem:[%s1068_s1 + $0x68] sm:$0xff]  ;;  %s827_s29 = smul.u32 24, %s1073_s16  ;;  %v845_v61 = vmov 0.0  }
   0xd   : > { %757 = vmatprep.subr.mxu1 %v227_v1  ;;  %723 = vmatpush3.msra.mxu0 %v648_v0  ;;  %v645_v6 = vld [vmem:[%s1068_s1 + $0xe0] sm:$0xff]  ;;  %v644_v8 = vld [vmem:[%s1068_s1 + $0xd8] sm:$0xff]  ;;  %v643_v10 = vld [vmem:[%s1068_s1 + $0xd0] sm:$0xff] }
   0xe   : > { %758 = vmatpush3.msra.mxu1 %v227_v1  ;;  %724 = vmatprep.subr.mxu0 %v647_v2  ;;  %v224_v7 = vld [vmem:[%s1068_s1 + $0x60] sm:$0xff]  ;;  %v223_v9 = vld [vmem:[%s1068_s1 + $0x58] sm:$0xff]  ;;  %v222_v11 = vld [vmem:[%s1068_s1 + $0x50] sm:$0xff]  ;;  %s199_s14 = scalar_lea.vmem %s1067_s0, %s827_s29  ;;  %s204_s25 = scalar_lea.vmem %s1070_s3, %s827_s29 }
   0xf   : > { %759 = vmatprep.subr.mxu1 %v226_v3  ;;  %725 = vmatpush3.msra.mxu0 %v647_v2  ;;  %v642_v12 = vld [vmem:[%s1068_s1 + $0xc8] sm:$0xff]  ;;  %v641_v14 = vld [vmem:[%s1068_s1 + $0xc0] sm:$0xff]  ;;  %v640_v16 = vld [vmem:[%s1068_s1 + $0xb8] sm:$0xff]  ;;  %517 = vst [vmem:[%s204_s25] sm:$0x1] %v845_v61  ;;  %s632_s29 = sshll.u32 %s1073_s16, 1 }
  0x10   : > { %760 = vmatpush3.msra.mxu1 %v226_v3  ;;  %726 = vmatprep.subr.mxu0 %v646_v4  ;;  %v221_v13 = vld [vmem:[%s1068_s1 + $0x48] sm:$0xff]  ;;  %v220_v15 = vld [vmem:[%s1068_s1 + $0x40] sm:$0xff]  ;;  %v219_v17 = vld [vmem:[%s1068_s1 + $0x38] sm:$0xff]  ;;  %518 = vst [vmem:[%s204_s25 + $0x11] sm:$0x1] %v845_v61  ;;  %s208_s5 = scalar_lea.vmem %s1071_s4, %s632_s29 }
  0x11   : > { %761 = vmatprep.subr.mxu1 %v225_v5  ;;  %727 = vmatpush3.msra.mxu0 %v646_v4  ;;  %v639_v18 = vld [vmem:[%s1068_s1 + $0xb0] sm:$0xff]  ;;  %v638_v20 = vld [vmem:[%s1068_s1 + $0xa8] sm:$0xff]  ;;  %v637_v22 = vld [vmem:[%s1068_s1 + $0xa0] sm:$0xff] }
  0x12   : > { %762 = vmatpush3.msra.mxu1 %v225_v5  ;;  %728 = vmatprep.subr.mxu0 %v645_v6  ;;  %v218_v19 = vld [vmem:[%s1068_s1 + $0x30] sm:$0xff]  ;;  %v217_v21 = vld [vmem:[%s1068_s1 + $0x28] sm:$0xff]  ;;  %v216_v23 = vld [vmem:[%s1068_s1 + $0x20] sm:$0xff] }
  0x13   : > { %763 = vmatprep.subr.mxu1 %v224_v7  ;;  %729 = vmatpush3.msra.mxu0 %v645_v6  ;;  %v636_v24 = vld [vmem:[%s1068_s1 + $0x98] sm:$0xff]  ;;  %v209_v26 = vld [vmem:[%s199_s14] sm:$0xff]  ;;  %v969_v27 = vld [vmem:[%s199_s14 + $0x8] sm:$0xff] }
  0x14   : > { %764 = vmatpush3.msra.mxu1 %v224_v7  ;;  %730 = vmatprep.subr.mxu0 %v644_v8  ;;  %v215_v25 = vld [vmem:[%s1068_s1 + $0x18] sm:$0xff]  ;;  %v635_v28 = vld [vmem:[%s1068_s1 + $0x90] sm:$0xff]  ;;  %v249_v31 = vrot.slane %v209_v26, 1  ;;  %v250_v32 = vrot.slane %v969_v27, 1  ;;  %v634_v33 = vld [vmem:[%s1068_s1 + $0x88] sm:$0xff]  ;;  %v424_v38 = vrot.slane %v209_v26, 2 }
  0x15   : > { %765 = vmatprep.subr.mxu1 %v223_v9  ;;  %731 = vmatpush3.msra.mxu0 %v644_v8  ;;  %v214_v29 = vld [vmem:[%s1068_s1 + $0x10] sm:$0xff]  ;;  %v213_v34 = vld [vmem:[%s1068_s1 + $0x8] sm:$0xff]  ;;  %v633_v36 = vld [vmem:[%s1068_s1 + $0x80] sm:$0xff]  ;;  %v425_v39 = vrot.slane %v969_v27, 2 }
  0x16   : > { %766 = vmatpush3.msra.mxu1 %v223_v9  ;;  %732 = vmatprep.subr.mxu0 %v643_v10  ;;  %v977_v30 = vld [vmem:[%s199_s14 + $0x10] sm:$0x3]  ;;  %v212_v37 = vld [vmem:[%s1068_s1] sm:$0xff]  ;;  %v251_v40 = vsel %vm248_vm0, %v249_v31, %v250_v32  ;;  %v664_v42 = vld [vmem:[%s1068_s1 + $0x178] sm:$0xff] }
  0x17   : > { %767 = vmatprep.subr.mxu1 %v222_v11  ;;  %733 = vmatpush3.msra.mxu0 %v643_v10  ;;  %v252_v35 = vrot.slane %v977_v30, 1  ;;  %v426_v43 = vsel %vm423_vm1, %v424_v38, %v425_v39  ;;  %v663_v44 = vld [vmem:[%s1068_s1 + $0x170] sm:$0xff]  ;;  %v662_v45 = vld [vmem:[%s1068_s1 + $0x168] sm:$0xff]  ;;  %v661_v46 = vld [vmem:[%s1068_s1 + $0x160] sm:$0xff]  ;;  %v427_v58 = vrot.slane %v977_v30, 2 }
  0x18   : > { %768 = vmatpush3.msra.mxu1 %v222_v11  ;;  %734 = vmatprep.subr.mxu0 %v642_v12  ;;  %v660_v47 = vld [vmem:[%s1068_s1 + $0x158] sm:$0xff]  ;;  %v659_v48 = vld [vmem:[%s1068_s1 + $0x150] sm:$0xff]  ;;  %v658_v49 = vld [vmem:[%s1068_s1 + $0x148] sm:$0xff] }
  0x19   : > { %769 = vmatprep.subr.mxu1 %v221_v13  ;;  %735 = vmatpush3.msra.mxu0 %v642_v12  ;;  %v253_v41 = vsel %vm248_vm0, %v250_v32, %v252_v35  ;;  %v657_v50 = vld [vmem:[%s1068_s1 + $0x140] sm:$0xff]  ;;  %v656_v51 = vld [vmem:[%s1068_s1 + $0x138] sm:$0xff]  ;;  %v655_v52 = vld [vmem:[%s1068_s1 + $0x130] sm:$0xff]  ;;  %v428_v60 = vsel %vm423_vm1, %v425_v39, %v427_v58 }
  0x1a   : > { %770 = vmatpush3.msra.mxu1 %v221_v13  ;;  %736 = vmatprep.subr.mxu0 %v641_v14  ;;  %v654_v53 = vld [vmem:[%s1068_s1 + $0x128] sm:$0xff]  ;;  %v653_v54 = vld [vmem:[%s1068_s1 + $0x120] sm:$0xff]  ;;  %v652_v55 = vld [vmem:[%s1068_s1 + $0x118] sm:$0xff] }
  0x1b   : > { %771 = vmatprep.subr.mxu1 %v220_v15  ;;  %737 = vmatpush3.msra.mxu0 %v641_v14  ;;  %v651_v56 = vld [vmem:[%s1068_s1 + $0x110] sm:$0xff]  ;;  %v650_v57 = vld [vmem:[%s1068_s1 + $0x108] sm:$0xff]  ;;  %v649_v59 = vld [vmem:[%s1068_s1 + $0x100] sm:$0xff] }
  0x1c   : > { %772 = vmatpush3.msra.mxu1 %v220_v15  ;;  %738 = vmatprep.subr.mxu0 %v640_v16  ;;  %v665_v4 = vld [vmem:[%s1069_s2] ss:$0 sm:$0xff] }
  0x1d   : > { %773 = vmatprep.subr.mxu1 %v219_v17  ;;  %739 = vmatpush3.msra.mxu0 %v640_v16 }
  0x1e   : > { %774 = vmatpush3.msra.mxu1 %v219_v17  ;;  %740 = vmatprep.subr.mxu0 %v639_v18 }
  0x1f   : > { %775 = vmatprep.subr.mxu1 %v218_v19  ;;  %741 = vmatpush3.msra.mxu0 %v639_v18 }
  0x20   : > { %776 = vmatpush3.msra.mxu1 %v218_v19  ;;  %742 = vmatprep.subr.mxu0 %v638_v20 }
  0x21   : > { %777 = vmatprep.subr.mxu1 %v217_v21  ;;  %743 = vmatpush3.msra.mxu0 %v638_v20 }
  0x22   : > { %778 = vmatpush3.msra.mxu1 %v217_v21  ;;  %744 = vmatprep.subr.mxu0 %v637_v22 }
  0x23   : > { %779 = vmatprep.subr.mxu1 %v216_v23  ;;  %745 = vmatpush3.msra.mxu0 %v637_v22 }
  0x24   : > { %780 = vmatpush3.msra.mxu1 %v216_v23  ;;  %746 = vmatprep.subr.mxu0 %v636_v24 }
  0x25   : > { %781 = vmatprep.subr.mxu1 %v215_v25  ;;  %747 = vmatpush3.msra.mxu0 %v636_v24 }
  0x26   : > { %782 = vmatpush3.msra.mxu1 %v215_v25  ;;  %748 = vmatprep.subr.mxu0 %v635_v28 }
  0x27   : > { %783 = vmatprep.subr.mxu1 %v214_v29  ;;  %749 = vmatpush3.msra.mxu0 %v635_v28 }
  0x28   : > { %784 = vmatpush3.msra.mxu1 %v214_v29  ;;  %750 = vmatprep.subr.mxu0 %v634_v33 }
  0x29   : > { %785 = vmatprep.subr.mxu1 %v213_v34  ;;  %751 = vmatpush3.msra.mxu0 %v634_v33 }
  0x2a   : > { %786 = vmatpush3.msra.mxu1 %v213_v34  ;;  %752 = vmatprep.subr.mxu0 %v633_v36 }
  0x2b   : > { %787 = vmatprep.subr.mxu1 %v212_v37  ;;  %753 = vmatpush3.msra.mxu0 %v633_v36 }
  0x2c   : > { %754 = vmatprep.mubr.f32.mxu0 %v251_v40  ;;  %788 = vmatpush3.msra.mxu1 %v212_v37 }
  0x2d   : > { %789 = vmatprep.mubr.f32.mxu1 %v209_v26  ;;  %755 = vmatmul.mubr.f32.vlgmr.msra.gmra.mxu0 %v253_v41 }
  0x2e   : > { %790 = vmatmul.mubr.f32.vlgmr.msra.gmra.mxu1 %v969_v27  ;;  %792 = vmatprep.subr.mxu0 %v664_v42 }
  0x2f   : > { %824 = vmatprep.mubr.f32.mxu0 %v426_v43  ;;  %793 = vmatpush3.msra.mxu0 %v664_v42 }
  0x30   : > { %794 = vmatprep.subr.mxu0 %v663_v44 }
  0x31   : > { %795 = vmatpush3.msra.mxu0 %v663_v44 }
  0x32   : > { %796 = vmatprep.subr.mxu0 %v662_v45 }
  0x33   : > { %797 = vmatpush3.msra.mxu0 %v662_v45 }
  0x34   : > { %798 = vmatprep.subr.mxu0 %v661_v46 }
  0x35   : > { %799 = vmatpush3.msra.mxu0 %v661_v46 }
  0x36   : > { %800 = vmatprep.subr.mxu0 %v660_v47 }
  0x37   : > { %801 = vmatpush3.msra.mxu0 %v660_v47 }
  0x38   : > { %802 = vmatprep.subr.mxu0 %v659_v48 }
  0x39   : > { %803 = vmatpush3.msra.mxu0 %v659_v48 }
  0x3a   : > { %804 = vmatprep.subr.mxu0 %v658_v49 }
  0x3b   : > { %805 = vmatpush3.msra.mxu0 %v658_v49 }
  0x3c   : > { %806 = vmatprep.subr.mxu0 %v657_v50 }
  0x3d   : > { %807 = vmatpush3.msra.mxu0 %v657_v50 }
  0x3e   : > { %808 = vmatprep.subr.mxu0 %v656_v51 }
  0x3f   : > { %809 = vmatpush3.msra.mxu0 %v656_v51 }
  0x40   : > { %810 = vmatprep.subr.mxu0 %v655_v52 }
  0x41   : > { %811 = vmatpush3.msra.mxu0 %v655_v52 }
  0x42   : > { %812 = vmatprep.subr.mxu0 %v654_v53 }
  0x43   : > { %813 = vmatpush3.msra.mxu0 %v654_v53 }
  0x44   : > { %814 = vmatprep.subr.mxu0 %v653_v54 }
  0x45   : > { %815 = vmatpush3.msra.mxu0 %v653_v54 }
  0x46   : > { %816 = vmatprep.subr.mxu0 %v652_v55 }
  0x47   : > { %817 = vmatpush3.msra.mxu0 %v652_v55 }
  0x48   : > { %818 = vmatprep.subr.mxu0 %v651_v56 }
  0x49   : > { %819 = vmatpush3.msra.mxu0 %v651_v56 }
  0x4a   : > { %820 = vmatprep.subr.mxu0 %v650_v57 }
  0x4b   : > { %821 = vmatpush3.msra.mxu0 %v650_v57 }
  0x4c   : > { %822 = vmatprep.subr.mxu0 %v649_v59 }
  0x4d   : > { %823 = vmatpush3.msra.mxu0 %v649_v59 }
  0x4e   : > { %825 = vmatmul.mubr.f32.vlgmr.msra.gmra.mxu0 %v428_v60 }
  0xed   : > { %v756_v62 = vpop.f32.mrf.mxu0 }
  0xee   : > { %v791_v63 = vpop.f32.mrf.mxu1 }
  0xef   : > { %v322_v0 = vpop.f32.mrf.mxu0  ;;  %v403_v2 = vadd.f32 %v791_v63, %v756_v62 }
  0xf0   : > { %v397_v1 = vpop.f32.mrf.mxu1 }
  0xf1   : > { %v398_v5 = vadd.f32 %v397_v1, %v322_v0 }
 0x10e   : > { %v826_v3 = vpop.f32.mrf.mxu0 }
 0x10f   : > { %v507_v6 = vadd.f32 %v826_v3, %v403_v2 }
 0x110   : > { %v497_v7 = vpop.f32.mrf.mxu0 }
 0x111   : > { %v516_v8 = vadd.f32 %v665_v4, %v507_v6  ;;  %v506_v9 = vadd.f32 %v497_v7, %v398_v5 }
 0x113   : > { %520 = vst [vmem:[%s204_s25 + $0x9] sm:$0xff] %v516_v8  ;;  %v515_v10 = vadd.f32 %v665_v4, %v506_v9  ;;  %v530_v11 = vmul.f32 %v516_v8, %v516_v8 }
 0x115   : > { %519 = vst [vmem:[%s204_s25 + $0x1] sm:$0xff] %v515_v10  ;;  %v521_v12 = vadd.f32 %v516_v8, %v515_v10  ;;  %v529_v13 = vmul.f32 %v515_v10, %v515_v10 }
 0x117   : > { %v522_v14 = vrot.slane %v521_v12, 4  ;;  %v531_v15 = vadd.f32 %v530_v11, %v529_v13 }
 0x119   : > { %v523_v16 = vadd.f32 %v522_v14, %v521_v12  ;;  %v532_v17 = vrot.slane %v531_v15, 4 }
 0x11b   : > { %v524_v18 = vrot.slane %v523_v16, 2  ;;  %v533_v19 = vadd.f32 %v532_v17, %v531_v15 }
 0x11d   : > { %v525_v20 = vadd.f32 %v524_v18, %v523_v16  ;;  %v534_v21 = vrot.slane %v533_v19, 2 }
 0x11f   : > { %v526_v22 = vrot.slane %v525_v20, 1  ;;  %v535_v23 = vadd.f32 %v534_v21, %v533_v19 }
 0x121   : > { %v527_v24 = vadd.f32 %v526_v22, %v525_v20  ;;  %v536_v25 = vrot.slane %v535_v23, 1 }
 0x123   : > { %528 = vst [vmem:[%s208_s5] sm:$0x1] %v527_v24  ;;  %v537_v26 = vadd.f32 %v536_v25, %v535_v23 }
 0x125   : > { %538 = vst [vmem:[%s208_s5 + $0x1] sm:$0x1] %v537_v26 }
 0x126 PF: > { %s15_s15 = sadd.s32 1, %s843_s15  }
 0x127   : > { %p12_p4 = scmp.ge.s32.totalorder %s15_s15, 4  }
 0x129   :  { %14 = sbr.rel (!%p12_p4) target bundleno = 1 (0x1), region = 76 }

// kernel: unet_block_up_forward.4
= control target key start
LH: loop header
LB: loop body
LE: loop exit
PB: predicated region body
PF: predicated region fallthrough
CT: control target
= control target key end

     0   :  { %s983_s21 = smov 0   ;;  %s1192_s0 = inlined_call_operand.vmem [shape: f32[2,18,128], index: 0, kind: input, shape index: {}]   ;;  %s1193_s1 = inlined_call_operand.vmem [shape: f32[1,128], index: 1, kind: input, shape index: {}]   ;;  %s1194_s2 = inlined_call_operand.vmem [shape: f32[1,128], index: 2, kind: input, shape index: {}]   ;;  %s1195_s3 = inlined_call_operand.vmem [shape: f32[3,128,128], index: 3, kind: input, shape index: {}]   ;;  %s1196_s4 = inlined_call_operand.vmem [shape: f32[1,128], index: 4, kind: input, shape index: {}]   ;;  %s1197_s5 = inlined_call_operand.vmem [shape: f32[2,18,128], index: 5, kind: output, shape index: {0}]   ;;  %s1198_s6 = inlined_call_operand.vmem [shape: f32[2,2,128], index: 6, kind: output, shape index: {1}]  }
   0x1 LB: > { %s724_s22 = sadd.s32 4294967295, %s945_s21   ;;  %p728_p0 = scmp.ge.s32.totalorder %s945_s21, 1  ;;  %s945_s21 = sphi %s983_s21, %s17_s21  }
   0x2   : > { %p215_p1 = scmp.lt.s32.totalorder %s945_s21, 3 }
   0x4   : > { %p216_p2 = pnand %p728_p0, %p215_p1 }
   0x5   : > { %p249_p3 = scmp.lt.s32.totalorder (!%p216_p2), %s724_s22, 1 }
   0x6   : > { %219 = sbr.rel (%p216_p2) target bundleno = 294 (0x126), region = 40 }
   0xb   : > { %v749_v0 = vld [vmem:[%s1195_s3 + $0xf8] sm:$0xff]  ;;  %v748_v2 = vld [vmem:[%s1195_s3 + $0xf0] sm:$0xff]  ;;  %v747_v4 = vld [vmem:[%s1195_s3 + $0xe8] sm:$0xff]  ;;  %s1200_s22 = smov (!%p249_p3, %s724_s22), 1  ;;  %v266_v12 = vlaneseq  ;;  %vm347_vm2 = vcmask 1046528   ;;  %vm522_vm3 = vcmask 1045504  }
   0xc   : > { %v326_v1 = vld [vmem:[%s1195_s3 + $0x78] sm:$0xff]  ;;  %824 = vmatprep.subr.mxu0 %v749_v0  ;;  %v325_v3 = vld [vmem:[%s1195_s3 + $0x70] sm:$0xff]  ;;  %v324_v5 = vld [vmem:[%s1195_s3 + $0x68] sm:$0xff]  ;;  %s929_s15 = smul.u32 24, %s1200_s22 }
   0xd   : > { %859 = vmatprep.subr.mxu1 %v326_v1  ;;  %825 = vmatpush3.msra.mxu0 %v749_v0  ;;  %v746_v6 = vld [vmem:[%s1195_s3 + $0xe0] sm:$0xff]  ;;  %v745_v8 = vld [vmem:[%s1195_s3 + $0xd8] sm:$0xff]  ;;  %v744_v10 = vld [vmem:[%s1195_s3 + $0xd0] sm:$0xff]  ;;  %v1053_v23 = vshrl.u32 %v266_v12, 7 }
   0xe   : > { %860 = vmatpush3.msra.mxu1 %v326_v1  ;;  %826 = vmatprep.subr.mxu0 %v748_v2  ;;  %v323_v7 = vld [vmem:[%s1195_s3 + $0x60] sm:$0xff]  ;;  %v322_v9 = vld [vmem:[%s1195_s3 + $0x58] sm:$0xff]  ;;  %s253_s24 = scalar_lea.vmem %s1192_s0, %s929_s15  ;;  %v321_v11 = vld [vmem:[%s1195_s3 + $0x50] sm:$0xff]  ;;  %s258_s23 = scalar_lea.vmem %s1197_s5, %s929_s15 }
   0xf   : > { %861 = vmatprep.subr.mxu1 %v325_v3  ;;  %827 = vmatpush3.msra.mxu0 %v748_v2  ;;  %v743_v13 = vld [vmem:[%s1195_s3 + $0xc8] sm:$0xff]  ;;  %v263_v15 = vld [vmem:[%s253_s24] sm:$0xff]  ;;  %v265_v22 = vld [vmem:[%s253_s24 + $0x10] sm:$0x3]  ;;  %v269_v33 = vadd.s32 16, %v1053_v23  ;;  %vm270_vm0 = vcmp.ge.s32.totalorder %v1053_v23, 1 }
  0x10   : > { %862 = vmatpush3.msra.mxu1 %v325_v3  ;;  %828 = vmatprep.subr.mxu0 %v747_v4  ;;  %v320_v14 = vld [vmem:[%s1195_s3 + $0x48] sm:$0xff]  ;;  %v732_v17 = vld [vmem:[%s1193_s1] ss:$0 sm:$0xff]  ;;  %v741_v26 = vld [vmem:[%s1195_s3 + $0xb8] sm:$0xff]  ;;  %s731_s15 = sshll.u32 %s1200_s22, 1 }
  0x11   : > { %863 = vmatprep.subr.mxu1 %v324_v5  ;;  %829 = vmatpush3.msra.mxu0 %v747_v4  ;;  %v264_v16 = vld [vmem:[%s253_s24 + $0x8] sm:$0xff]  ;;  %v733_v18 = vld [vmem:[%s1194_s2] ss:$0 sm:$0xff]  ;;  %v286_v21 = vmul.f32 %v732_v17, %v263_v15  ;;  %v288_v25 = vmul.f32 %v732_v17, %v265_v22  ;;  %v318_v27 = vld [vmem:[%s1195_s3 + $0x38] sm:$0xff]  ;;  %vm275_vm1 = vcmp.le.s32.totalorder %v269_v33, 16  ;;  %s262_s28 = scalar_lea.vmem %s1198_s6, %s731_s15 }
  0x12   : > { %864 = vmatpush3.msra.mxu1 %v324_v5  ;;  %830 = vmatprep.subr.mxu0 %v746_v6  ;;  %v742_v19 = vld [vmem:[%s1195_s3 + $0xc0] sm:$0xff]  ;;  %v287_v24 = vmul.f32 %v732_v17, %v264_v16  ;;  %v740_v29 = vld [vmem:[%s1195_s3 + $0xb0] sm:$0xff]  ;;  %v739_v34 = vld [vmem:[%s1195_s3 + $0xa8] sm:$0xff] }
  0x13   : > { %865 = vmatprep.subr.mxu1 %v323_v7  ;;  %831 = vmatpush3.msra.mxu0 %v746_v6  ;;  %v319_v20 = vld [vmem:[%s1195_s3 + $0x40] sm:$0xff]  ;;  %v1061_v28 = vadd.f32 %v733_v18, %v286_v21  ;;  %v317_v30 = vld [vmem:[%s1195_s3 + $0x30] sm:$0xff]  ;;  %v298_v31 = vadd.f32 %v733_v18, %v288_v25  ;;  %v316_v35 = vld [vmem:[%s1195_s3 + $0x28] sm:$0xff] }
  0x14   : > { %866 = vmatpush3.msra.mxu1 %v323_v7  ;;  %832 = vmatprep.subr.mxu0 %v745_v8  ;;  %v297_v32 = vadd.f32 %v733_v18, %v287_v24  ;;  %v738_v37 = vld [vmem:[%s1195_s3 + $0xa0] sm:$0xff]  ;;  %v737_v41 = vld [vmem:[%s1195_s3 + $0x98] sm:$0xff]  ;;  %v736_v44 = vld [vmem:[%s1195_s3 + $0x90] sm:$0xff] }
  0x15   : > { %867 = vmatprep.subr.mxu1 %v322_v9  ;;  %833 = vmatpush3.msra.mxu0 %v745_v8  ;;  %v299_v36 = vmax.f32 %v1061_v28, 0.0  ;;  %v315_v38 = vld [vmem:[%s1195_s3 + $0x20] sm:$0xff]  ;;  %v301_v39 = vmax.f32 %v298_v31, 0.0  ;;  %v314_v42 = vld [vmem:[%s1195_s3 + $0x18] sm:$0xff]  ;;  %v313_v45 = vld [vmem:[%s1195_s3 + $0x10] sm:$0xff] }
  0x16   : > { %868 = vmatpush3.msra.mxu1 %v322_v9  ;;  %834 = vmatprep.subr.mxu0 %v744_v10  ;;  %v1084_v40 = vmax.f32 %v297_v32, 0.0  ;;  %v735_v49 = vld [vmem:[%s1195_s3 + $0x88] sm:$0xff]  ;;  %v734_v52 = vld [vmem:[%s1195_s3 + $0x80] sm:$0xff]  ;;  %v766_v58 = vld [vmem:[%s1195_s3 + $0x178] sm:$0xff] }
  0x17   : > { %869 = vmatprep.subr.mxu1 %v321_v11  ;;  %835 = vmatpush3.msra.mxu0 %v744_v10  ;;  %v308_v43 = vsel %vm270_vm0, %v299_v36, 0.0  ;;  %v1100_v46 = vsel %vm275_vm1, %v301_v39, 0.0  ;;  %v312_v50 = vld [vmem:[%s1195_s3 + $0x8] sm:$0xff]  ;;  %v311_v53 = vld [vmem:[%s1195_s3] sm:$0xff]  ;;  %v765_v60 = vld [vmem:[%s1195_s3 + $0x170] sm:$0xff] }
  0x18   : > { %870 = vmatpush3.msra.mxu1 %v321_v11  ;;  %836 = vmatprep.subr.mxu0 %v743_v13  ;;  %v348_v47 = vrot.slane %v308_v43, 1  ;;  %v349_v48 = vrot.slane %v1084_v40, 1  ;;  %v351_v51 = vrot.slane %v1100_v46, 1  ;;  %v523_v54 = vrot.slane %v308_v43, 2  ;;  %v764_v61 = vld [vmem:[%s1195_s3 + $0x168] sm:$0xff]  ;;  %v763_v62 = vld [vmem:[%s1195_s3 + $0x160] sm:$0xff] }
  0x19   : > { %871 = vmatprep.subr.mxu1 %v320_v14  ;;  %837 = vmatpush3.msra.mxu0 %v743_v13  ;;  %v524_v55 = vrot.slane %v1084_v40, 2  ;;  %v762_v63 = vld [vmem:[%s1195_s3 + $0x158] sm:$0xff]  ;;  %v761_v0 = vld [vmem:[%s1195_s3 + $0x150] sm:$0xff]  ;;  %v760_v1 = vld [vmem:[%s1195_s3 + $0x148] sm:$0xff]  ;;  %v526_v10 = vrot.slane %v1100_v46, 2  ;;  %v947_v13 = vmov 0.0  }
  0x1a   : > { %872 = vmatpush3.msra.mxu1 %v320_v14  ;;  %838 = vmatprep.subr.mxu0 %v742_v19  ;;  %v350_v56 = vsel %vm347_vm2, %v348_v47, %v349_v48  ;;  %v352_v57 = vsel %vm347_vm2, %v349_v48, %v351_v51  ;;  %v759_v2 = vld [vmem:[%s1195_s3 + $0x140] sm:$0xff]  ;;  %v758_v3 = vld [vmem:[%s1195_s3 + $0x138] sm:$0xff]  ;;  %v757_v4 = vld [vmem:[%s1195_s3 + $0x130] sm:$0xff]  ;;  %616 = vst [vmem:[%s258_s23] sm:$0x1] %v947_v13 }
  0x1b   : > { %873 = vmatprep.subr.mxu1 %v319_v20  ;;  %839 = vmatpush3.msra.mxu0 %v742_v19  ;;  %v525_v59 = vsel %vm522_vm3, %v523_v54, %v524_v55  ;;  %v756_v5 = vld [vmem:[%s1195_s3 + $0x128] sm:$0xff]  ;;  %v755_v6 = vld [vmem:[%s1195_s3 + $0x120] sm:$0xff]  ;;  %v754_v7 = vld [vmem:[%s1195_s3 + $0x118] sm:$0xff]  ;;  %v527_v12 = vsel %vm522_vm3, %v524_v55, %v526_v10  ;;  %617 = vst [vmem:[%s258_s23 + $0x11] sm:$0x1] %v947_v13 }
  0x1c   : > { %874 = vmatpush3.msra.mxu1 %v319_v20  ;;  %840 = vmatprep.subr.mxu0 %v741_v26  ;;  %v753_v8 = vld [vmem:[%s1195_s3 + $0x110] sm:$0xff]  ;;  %v752_v9 = vld [vmem:[%s1195_s3 + $0x108] sm:$0xff]  ;;  %v751_v11 = vld [vmem:[%s1195_s3 + $0x100] sm:$0xff] }
  0x1d   : > { %875 = vmatprep.subr.mxu1 %v318_v27  ;;  %841 = vmatpush3.msra.mxu0 %v741_v26  ;;  %v767_v20 = vld [vmem:[%s1196_s4] ss:$0 sm:$0xff] }
  0x1e   : > { %876 = vmatpush3.msra.mxu1 %v318_v27  ;;  %842 = vmatprep.subr.mxu0 %v740_v29 }
  0x1f   : > { %877 = vmatprep.subr.mxu1 %v317_v30  ;;  %843 = vmatpush3.msra.mxu0 %v740_v29 }
  0x20   : > { %878 = vmatpush3.msra.mxu1 %v317_v30  ;;  %844 = vmatprep.subr.mxu0 %v739_v34 }
  0x21   : > { %879 = vmatprep.subr.mxu1 %v316_v35  ;;  %845 = vmatpush3.msra.mxu0 %v739_v34 }
  0x22   : > { %880 = vmatpush3.msra.mxu1 %v316_v35  ;;  %846 = vmatprep.subr.mxu0 %v738_v37 }
  0x23   : > { %881 = vmatprep.subr.mxu1 %v315_v38  ;;  %847 = vmatpush3.msra.mxu0 %v738_v37 }
  0x24   : > { %882 = vmatpush3.msra.mxu1 %v315_v38  ;;  %848 = vmatprep.subr.mxu0 %v737_v41 }
  0x25   : > { %883 = vmatprep.subr.mxu1 %v314_v42  ;;  %849 = vmatpush3.msra.mxu0 %v737_v41 }
  0x26   : > { %884 = vmatpush3.msra.mxu1 %v314_v42  ;;  %850 = vmatprep.subr.mxu0 %v736_v44 }
  0x27   : > { %885 = vmatprep.subr.mxu1 %v313_v45  ;;  %851 = vmatpush3.msra.mxu0 %v736_v44 }
  0x28   : > { %886 = vmatpush3.msra.mxu1 %v313_v45  ;;  %852 = vmatprep.subr.mxu0 %v735_v49 }
  0x29   : > { %887 = vmatprep.subr.mxu1 %v312_v50  ;;  %853 = vmatpush3.msra.mxu0 %v735_v49 }
  0x2a   : > { %888 = vmatpush3.msra.mxu1 %v312_v50  ;;  %854 = vmatprep.subr.mxu0 %v734_v52 }
  0x2b   : > { %889 = vmatprep.subr.mxu1 %v311_v53  ;;  %855 = vmatpush3.msra.mxu0 %v734_v52 }
  0x2c   : > { %856 = vmatprep.mubr.f32.mxu0 %v350_v56  ;;  %890 = vmatpush3.msra.mxu1 %v311_v53 }
  0x2d   : > { %891 = vmatprep.mubr.msk.f32.mxu1 %vm270_vm0, %v299_v36  ;;  %857 = vmatmul.mubr.f32.vlgmr.msra.gmra.mxu0 %v352_v57 }
  0x2e   : > { %892 = vmatmul.mubr.f32.vlgmr.msra.gmra.mxu1 %v1084_v40  ;;  %894 = vmatprep.subr.mxu0 %v766_v58 }
  0x2f   : > { %926 = vmatprep.mubr.f32.mxu0 %v525_v59  ;;  %895 = vmatpush3.msra.mxu0 %v766_v58 }
  0x30   : > { %896 = vmatprep.subr.mxu0 %v765_v60 }
  0x31   : > { %897 = vmatpush3.msra.mxu0 %v765_v60 }
  0x32   : > { %898 = vmatprep.subr.mxu0 %v764_v61 }
  0x33   : > { %899 = vmatpush3.msra.mxu0 %v764_v61 }
  0x34   : > { %900 = vmatprep.subr.mxu0 %v763_v62 }
  0x35   : > { %901 = vmatpush3.msra.mxu0 %v763_v62 }
  0x36   : > { %902 = vmatprep.subr.mxu0 %v762_v63 }
  0x37   : > { %903 = vmatpush3.msra.mxu0 %v762_v63 }
  0x38   : > { %904 = vmatprep.subr.mxu0 %v761_v0 }
  0x39   : > { %905 = vmatpush3.msra.mxu0 %v761_v0 }
  0x3a   : > { %906 = vmatprep.subr.mxu0 %v760_v1 }
  0x3b   : > { %907 = vmatpush3.msra.mxu0 %v760_v1 }
  0x3c   : > { %908 = vmatprep.subr.mxu0 %v759_v2 }
  0x3d   : > { %909 = vmatpush3.msra.mxu0 %v759_v2 }
  0x3e   : > { %910 = vmatprep.subr.mxu0 %v758_v3 }
  0x3f   : > { %911 = vmatpush3.msra.mxu0 %v758_v3 }
  0x40   : > { %912 = vmatprep.subr.mxu0 %v757_v4 }
  0x41   : > { %913 = vmatpush3.msra.mxu0 %v757_v4 }
  0x42   : > { %914 = vmatprep.subr.mxu0 %v756_v5 }
  0x43   : > { %915 = vmatpush3.msra.mxu0 %v756_v5 }
  0x44   : > { %916 = vmatprep.subr.mxu0 %v755_v6 }
  0x45   : > { %917 = vmatpush3.msra.mxu0 %v755_v6 }
  0x46   : > { %918 = vmatprep.subr.mxu0 %v754_v7 }
  0x47   : > { %919 = vmatpush3.msra.mxu0 %v754_v7 }
  0x48   : > { %920 = vmatprep.subr.mxu0 %v753_v8 }
  0x49   : > { %921 = vmatpush3.msra.mxu0 %v753_v8 }
  0x4a   : > { %922 = vmatprep.subr.mxu0 %v752_v9 }
  0x4b   : > { %923 = vmatpush3.msra.mxu0 %v752_v9 }
  0x4c   : > { %924 = vmatprep.subr.mxu0 %v751_v11 }
  0x4d   : > { %925 = vmatpush3.msra.mxu0 %v751_v11 }
  0x4e   : > { %927 = vmatmul.mubr.f32.vlgmr.msra.gmra.mxu0 %v527_v12 }
  0xed   : > { %v858_v14 = vpop.f32.mrf.mxu0 }
  0xee   : > { %v893_v15 = vpop.f32.mrf.mxu1 }
  0xef   : > { %v421_v16 = vpop.f32.mrf.mxu0  ;;  %v502_v18 = vadd.f32 %v893_v15, %v858_v14 }
  0xf0   : > { %v496_v17 = vpop.f32.mrf.mxu1 }
  0xf1   : > { %v497_v21 = vadd.f32 %v496_v17, %v421_v16 }
 0x10e   : > { %v928_v19 = vpop.f32.mrf.mxu0 }
 0x10f   : > { %v606_v22 = vadd.f32 %v928_v19, %v502_v18 }
 0x110   : > { %v596_v23 = vpop.f32.mrf.mxu0 }
 0x111   : > { %v615_v24 = vadd.f32 %v767_v20, %v606_v22  ;;  %v605_v25 = vadd.f32 %v596_v23, %v497_v21 }
 0x113   : > { %619 = vst [vmem:[%s258_s23 + $0x9] sm:$0xff] %v615_v24  ;;  %v614_v26 = vadd.f32 %v767_v20, %v605_v25  ;;  %v629_v27 = vmul.f32 %v615_v24, %v615_v24 }
 0x115   : > { %618 = vst [vmem:[%s258_s23 + $0x1] sm:$0xff] %v614_v26  ;;  %v620_v28 = vadd.f32 %v615_v24, %v614_v26  ;;  %v628_v29 = vmul.f32 %v614_v26, %v614_v26 }
 0x117   : > { %v621_v30 = vrot.slane %v620_v28, 4  ;;  %v630_v31 = vadd.f32 %v629_v27, %v628_v29 }
 0x119   : > { %v622_v32 = vadd.f32 %v621_v30, %v620_v28  ;;  %v631_v33 = vrot.slane %v630_v31, 4 }
 0x11b   : > { %v623_v34 = vrot.slane %v622_v32, 2  ;;  %v632_v35 = vadd.f32 %v631_v33, %v630_v31 }
 0x11d   : > { %v624_v36 = vadd.f32 %v623_v34, %v622_v32  ;;  %v633_v37 = vrot.slane %v632_v35, 2 }
 0x11f   : > { %v625_v38 = vrot.slane %v624_v36, 1  ;;  %v634_v39 = vadd.f32 %v633_v37, %v632_v35 }
 0x121   : > { %v626_v40 = vadd.f32 %v625_v38, %v624_v36  ;;  %v635_v41 = vrot.slane %v634_v39, 1 }
 0x123   : > { %627 = vst [vmem:[%s262_s28] sm:$0x1] %v626_v40  ;;  %v636_v42 = vadd.f32 %v635_v41, %v634_v39 }
 0x125   : > { %637 = vst [vmem:[%s262_s28 + $0x1] sm:$0x1] %v636_v42 }
 0x126 PF: > { %s17_s21 = sadd.s32 1, %s945_s21  }
 0x127   : > { %p14_p4 = scmp.ge.s32.totalorder %s17_s21, 4  }
 0x129   :  { %16 = sbr.rel (!%p14_p4) target bundleno = 1 (0x1), region = 84 }

// kernel: tile.58
= control target key start
LH: loop header
LB: loop body
LE: loop exit
PB: predicated region body
PF: predicated region fallthrough
CT: control target
= control target key end

     0   :  { %s40_s0 = inlined_call_operand.vmem [shape: f32[4], index: 0, kind: input, shape index: {}]   ;;  %s41_s1 = inlined_call_operand.vmem [shape: f32[32,4], index: 1, kind: output, shape index: {}]  }
   0x1   :  { %v4_v0 = vld [vmem:[%s40_s0] ss:$0 sm:$0xff] }
   0x2   :  { %5 = vst [vmem:[%s41_s1] sm:$0xff] %v4_v0  ;;  %12 = vst [vmem:[%s41_s1 + $0x8] sm:$0xff] %v4_v0 }
   0x3   :  { %13 = vst [vmem:[%s41_s1 + $0x10] sm:$0xff] %v4_v0  ;;  %14 = vst [vmem:[%s41_s1 + $0x18] sm:$0xff] %v4_v0 }

// kernel: tile.59
= control target key start
LH: loop header
LB: loop body
LE: loop exit
PB: predicated region body
PF: predicated region fallthrough
CT: control target
= control target key end

     0   :  { %s261_s10 = smov 124   ;;  %s262_s11 = smov 116   ;;  %vm3_vm0 = vcmask 31744   ;;  %vm9_vm1 = vcmask 1048544   ;;  %vm15_vm2 = vcmask 1015744   ;;  %vm21_vm3 = vcmask 982944   ;;  %s401_s0 = inlined_call_operand.vmem [shape: f32[32,4], index: 0, kind: input, shape index: {}]   ;;  %s402_s1 = inlined_call_operand.vmem [shape: f32[1,128], index: 1, kind: output, shape index: {}]  }
   0x1   :  { %v199_v0 = vld [vmem:[%s401_s0 + $0x1f] sm:$0x1]   ;;  %v201_v1 = vld [vmem:[%s401_s0 + $0x1d] sm:$0x1]   ;;  %v200_v2 = vld [vmem:[%s401_s0 + $0x1e] sm:$0x1]  }
   0x2   :  { %7 = vrot.lane.b32.xlu0 %v199_v0, %s261_s10  ;;  %19 = vrot.lane.b32.xlu1 %v201_v1, %s262_s11  ;;  %v202_v3 = vld [vmem:[%s401_s0 + $0x1c] sm:$0x1]   ;;  %s263_s16 = smov 120   ;;  %s264_s17 = smov 112   ;;  %v203_v4 = vld [vmem:[%s401_s0 + $0x1b] sm:$0x1]  }
   0x3   :  { %v204_v5 = vld [vmem:[%s401_s0 + $0x1a] sm:$0x1]   ;;  %s265_s22 = smov 108   ;;  %s266_s23 = smov 104   ;;  %v205_v6 = vld [vmem:[%s401_s0 + $0x19] sm:$0x1]  }
   0x4   :  { %v206_v7 = vld [vmem:[%s401_s0 + $0x18] sm:$0x1]   ;;  %s267_s28 = smov 100   ;;  %s268_s29 = smov 96   ;;  %v207_v8 = vld [vmem:[%s401_s0 + $0x17] sm:$0x1]  }
   0x5   :  { %v208_v9 = vld [vmem:[%s401_s0 + $0x16] sm:$0x1]   ;;  %v2_v10 = vld [vmem:[%s401_s0] sm:$0x1]   ;;  %s269_s7 = smov 92   ;;  %s270_s8 = smov 88  }
   0x6   :  { %13 = vrot.lane.b32.xlu0 %v200_v2, %s263_s16  ;;  %25 = vrot.lane.b32.xlu1 %v202_v3, %s264_s17  ;;  %4 = vst.msk [vmem:[#allocation0] sm:$0x1] %vm3_vm0, %v2_v10   ;;  %v209_v11 = vld [vmem:[%s401_s0 + $0x15] sm:$0x1]   ;;  %v210_v12 = vld [vmem:[%s401_s0 + $0x14] sm:$0x1]  }
   0x7   :  { %s271_s13 = smov 84   ;;  %s272_s14 = smov 80   ;;  %v211_v13 = vld [vmem:[%s401_s0 + $0x13] sm:$0x1]   ;;  %v212_v14 = vld [vmem:[%s401_s0 + $0x12] sm:$0x1]  }
   0x8   :  { %s273_s19 = smov 76   ;;  %s274_s20 = smov 72   ;;  %v213_v15 = vld [vmem:[%s401_s0 + $0x11] sm:$0x1]   ;;  %v214_v16 = vld [vmem:[%s401_s0 + $0x10] sm:$0x1]  }
   0x9   :  { %s275_s25 = smov 68   ;;  %s276_s26 = smov 64   ;;  %v215_v17 = vld [vmem:[%s401_s0 + $0xf] sm:$0x1]   ;;  %v216_v18 = vld [vmem:[%s401_s0 + $0xe] sm:$0x1]  }
   0xa   :  { %31 = vrot.lane.b32.xlu0 %v203_v4, %s265_s22  ;;  %37 = vrot.lane.b32.xlu1 %v204_v5, %s266_s23  ;;  %s277_s2 = smov 60   ;;  %s278_s3 = smov 56   ;;  %v217_v19 = vld [vmem:[%s401_s0 + $0xd] sm:$0x1]   ;;  %v218_v20 = vld [vmem:[%s401_s0 + $0xc] sm:$0x1]  }
   0xb   :  { %s280_s9 = smov 48   ;;  %v219_v21 = vld [vmem:[%s401_s0 + $0xb] sm:$0x1]   ;;  %v220_v22 = vld [vmem:[%s401_s0 + $0xa] sm:$0x1]   ;;  %s282_s15 = smov 40  }
   0xc   :  { %v221_v23 = vld [vmem:[%s401_s0 + $0x9] sm:$0x1]   ;;  %v222_v24 = vld [vmem:[%s401_s0 + $0x8] sm:$0x1]   ;;  %s284_s21 = smov 32   ;;  %s286_s27 = smov 24  }
   0xd   :  { %v223_v25 = vld [vmem:[%s401_s0 + $0x7] sm:$0x1]   ;;  %v224_v26 = vld [vmem:[%s401_s0 + $0x6] sm:$0x1]   ;;  %v225_v27 = vld [vmem:[%s401_s0 + $0x5] sm:$0x1]  }
   0xe   :  { %43 = vrot.lane.b32.xlu0 %v205_v6, %s267_s28  ;;  %49 = vrot.lane.b32.xlu1 %v206_v7, %s268_s29  ;;  %v226_v28 = vld [vmem:[%s401_s0 + $0x4] sm:$0x1]   ;;  %s288_s4 = smov 16   ;;  %v227_v29 = vld [vmem:[%s401_s0 + $0x3] sm:$0x1]   ;;  %s290_s10 = smov 8  }
   0xf   :  { %v228_v30 = vld [vmem:[%s401_s0 + $0x2] sm:$0x1]   ;;  %v229_v31 = vld [vmem:[%s401_s0 + $0x1] sm:$0x1]   ;;  %s291_s0 = smov 4   ;;  %vm27_vm4 = vcmask 950144  }
  0x10   :  { %vm33_vm5 = vcmask 917344   ;;  %vm39_vm6 = vcmask 884544   ;;  %vm45_vm7 = vcmask 851744   ;;  %vm51_vm8 = vcmask 818944  }
  0x11   :  { %vm57_vm9 = vcmask 786144   ;;  %vm63_vm10 = vcmask 753344   ;;  %vm69_vm11 = vcmask 720544   ;;  %vm75_vm12 = vcmask 687744  }
  0x12   :  { %55 = vrot.lane.b32.xlu0 %v207_v8, %s269_s7  ;;  %61 = vrot.lane.b32.xlu1 %v208_v9, %s270_s8  ;;  %s279_s8 = smov 52   ;;  %vm81_vm13 = vcmask 654944   ;;  %vm87_vm14 = vcmask 622144   ;;  %vm93_vm15 = vcmask 589344   ;;  %vm99_vm0 = vcmask 556544  }
  0x16   :  { %67 = vrot.lane.b32.xlu0 %v209_v11, %s271_s13  ;;  %73 = vrot.lane.b32.xlu1 %v210_v12, %s272_s14  ;;  %s281_s14 = smov 44  }
  0x1a   :  { %79 = vrot.lane.b32.xlu0 %v211_v13, %s273_s19  ;;  %85 = vrot.lane.b32.xlu1 %v212_v14, %s274_s20  ;;  %s283_s20 = smov 36  }
  0x1e   :  { %91 = vrot.lane.b32.xlu0 %v213_v15, %s275_s25  ;;  %97 = vrot.lane.b32.xlu1 %v214_v16, %s276_s26  ;;  %s285_s26 = smov 28  }
  0x22   :  { %103 = vrot.lane.b32.xlu0 %v215_v17, %s277_s2  ;;  %109 = vrot.lane.b32.xlu1 %v216_v18, %s278_s3  ;;  %s287_s3 = smov 20  }
  0x26   :  { %115 = vrot.lane.b32.xlu0 %v217_v19, %s279_s8  ;;  %121 = vrot.lane.b32.xlu1 %v218_v20, %s280_s9  ;;  %s289_s9 = smov 12  }
  0x2a   :  { %127 = vrot.lane.b32.xlu0 %v219_v21, %s281_s14  ;;  %133 = vrot.lane.b32.xlu1 %v220_v22, %s282_s15 }
  0x2e   :  { %139 = vrot.lane.b32.xlu0 %v221_v23, %s283_s20  ;;  %145 = vrot.lane.b32.xlu1 %v222_v24, %s284_s21 }
  0x32   :  { %151 = vrot.lane.b32.xlu0 %v223_v25, %s285_s26  ;;  %157 = vrot.lane.b32.xlu1 %v224_v26, %s286_s27 }
  0x36   :  { %163 = vrot.lane.b32.xlu0 %v225_v27, %s287_s3  ;;  %169 = vrot.lane.b32.xlu1 %v226_v28, %s288_s4 }
  0x3a   :  { %175 = vrot.lane.b32.xlu0 %v227_v29, %s289_s9  ;;  %181 = vrot.lane.b32.xlu1 %v228_v30, %s290_s10 }
  0x3e   :  { %187 = vrot.lane.b32.xlu0 %v229_v31, %s291_s0 }
  0x74   :  { %v8_v32 = vpop.permute.xlu0 %7   ;;  %v20_v33 = vpop.permute.xlu1 %19  }
  0x75   :  { %10 = vst.msk [vmem:[#allocation0] sm:$0x1] %vm9_vm1, %v8_v32   ;;  %vm105_vm1 = vcmask 523744  }
  0x78   :  { %v14_v34 = vpop.permute.xlu0 %13   ;;  %v26_v35 = vpop.permute.xlu1 %25  }
  0x79   :  { %16 = vst.msk [vmem:[#allocation0] sm:$0x1] %vm15_vm2, %v14_v34   ;;  %vm111_vm2 = vcmask 490944  }
  0x7a   :  { %22 = vst.msk [vmem:[#allocation0] sm:$0x1] %vm21_vm3, %v20_v33   ;;  %vm117_vm3 = vcmask 458144  }
  0x7b   :  { %28 = vst.msk [vmem:[#allocation0] sm:$0x1] %vm27_vm4, %v26_v35   ;;  %vm123_vm4 = vcmask 425344  }
  0x7c   :  { %v32_v36 = vpop.permute.xlu0 %31   ;;  %v38_v37 = vpop.permute.xlu1 %37  }
  0x7d   :  { %34 = vst.msk [vmem:[#allocation0] sm:$0x1] %vm33_vm5, %v32_v36   ;;  %vm129_vm5 = vcmask 392544  }
  0x7e   :  { %40 = vst.msk [vmem:[#allocation0] sm:$0x1] %vm39_vm6, %v38_v37   ;;  %vm135_vm6 = vcmask 359744  }
  0x80   :  { %v44_v38 = vpop.permute.xlu0 %43   ;;  %v50_v39 = vpop.permute.xlu1 %49  }
  0x81   :  { %46 = vst.msk [vmem:[#allocation0] sm:$0x1] %vm45_vm7, %v44_v38   ;;  %vm141_vm7 = vcmask 326944  }
  0x82   :  { %52 = vst.msk [vmem:[#allocation0] sm:$0x1] %vm51_vm8, %v50_v39   ;;  %vm147_vm8 = vcmask 294144  }
  0x84   :  { %v56_v40 = vpop.permute.xlu0 %55   ;;  %v62_v41 = vpop.permute.xlu1 %61  }
  0x85   :  { %58 = vst.msk [vmem:[#allocation0] sm:$0x1] %vm57_vm9, %v56_v40   ;;  %vm153_vm9 = vcmask 261344  }
  0x86   :  { %64 = vst.msk [vmem:[#allocation0] sm:$0x1] %vm63_vm10, %v62_v41   ;;  %vm159_vm10 = vcmask 228544  }
  0x88   :  { %v68_v42 = vpop.permute.xlu0 %67   ;;  %v74_v43 = vpop.permute.xlu1 %73  }
  0x89   :  { %70 = vst.msk [vmem:[#allocation0] sm:$0x1] %vm69_vm11, %v68_v42   ;;  %vm165_vm11 = vcmask 195744  }
  0x8a   :  { %76 = vst.msk [vmem:[#allocation0] sm:$0x1] %vm75_vm12, %v74_v43   ;;  %vm171_vm12 = vcmask 162944  }
  0x8c   :  { %v80_v44 = vpop.permute.xlu0 %79   ;;  %v86_v45 = vpop.permute.xlu1 %85  }
  0x8d   :  { %82 = vst.msk [vmem:[#allocation0] sm:$0x1] %vm81_vm13, %v80_v44   ;;  %vm177_vm13 = vcmask 130144  }
  0x8e   :  { %88 = vst.msk [vmem:[#allocation0] sm:$0x1] %vm87_vm14, %v86_v45   ;;  %vm183_vm14 = vcmask 97344  }
  0x90   :  { %v92_v46 = vpop.permute.xlu0 %91   ;;  %v98_v47 = vpop.permute.xlu1 %97  }
  0x91   :  { %94 = vst.msk [vmem:[#allocation0] sm:$0x1] %vm93_vm15, %v92_v46   ;;  %vm189_vm15 = vcmask 64544  }
  0x92   :  { %100 = vst.msk [vmem:[#allocation0] sm:$0x1] %vm99_vm0, %v98_v47  }
  0x94   :  { %v104_v48 = vpop.permute.xlu0 %103   ;;  %v110_v49 = vpop.permute.xlu1 %109  }
  0x95   :  { %106 = vst.msk [vmem:[#allocation0] sm:$0x1] %vm105_vm1, %v104_v48  }
  0x96   :  { %112 = vst.msk [vmem:[#allocation0] sm:$0x1] %vm111_vm2, %v110_v49  }
  0x98   :  { %v116_v50 = vpop.permute.xlu0 %115   ;;  %v122_v51 = vpop.permute.xlu1 %121  }
  0x99   :  { %118 = vst.msk [vmem:[#allocation0] sm:$0x1] %vm117_vm3, %v116_v50  }
  0x9a   :  { %124 = vst.msk [vmem:[#allocation0] sm:$0x1] %vm123_vm4, %v122_v51  }
  0x9c   :  { %v128_v52 = vpop.permute.xlu0 %127   ;;  %v134_v53 = vpop.permute.xlu1 %133  }
  0x9d   :  { %130 = vst.msk [vmem:[#allocation0] sm:$0x1] %vm129_vm5, %v128_v52  }
  0x9e   :  { %136 = vst.msk [vmem:[#allocation0] sm:$0x1] %vm135_vm6, %v134_v53  }
  0xa0   :  { %v140_v54 = vpop.permute.xlu0 %139   ;;  %v146_v55 = vpop.permute.xlu1 %145  }
  0xa1   :  { %142 = vst.msk [vmem:[#allocation0] sm:$0x1] %vm141_vm7, %v140_v54  }
  0xa2   :  { %148 = vst.msk [vmem:[#allocation0] sm:$0x1] %vm147_vm8, %v146_v55  }
  0xa4   :  { %v152_v56 = vpop.permute.xlu0 %151   ;;  %v158_v57 = vpop.permute.xlu1 %157  }
  0xa5   :  { %154 = vst.msk [vmem:[#allocation0] sm:$0x1] %vm153_vm9, %v152_v56  }
  0xa6   :  { %160 = vst.msk [vmem:[#allocation0] sm:$0x1] %vm159_vm10, %v158_v57  }
  0xa8   :  { %v164_v58 = vpop.permute.xlu0 %163   ;;  %v170_v59 = vpop.permute.xlu1 %169  }
  0xa9   :  { %166 = vst.msk [vmem:[#allocation0] sm:$0x1] %vm165_vm11, %v164_v58  }
  0xaa   :  { %172 = vst.msk [vmem:[#allocation0] sm:$0x1] %vm171_vm12, %v170_v59  }
  0xac   :  { %v176_v60 = vpop.permute.xlu0 %175   ;;  %v182_v61 = vpop.permute.xlu1 %181  }
  0xad   :  { %178 = vst.msk [vmem:[#allocation0] sm:$0x1] %vm177_vm13, %v176_v60  }
  0xae   :  { %184 = vst.msk [vmem:[#allocation0] sm:$0x1] %vm183_vm14, %v182_v61  }
  0xb0   :  { %v188_v62 = vpop.permute.xlu0 %187  }
  0xb1   :  { %190 = vst.msk [vmem:[#allocation0] sm:$0x1] %vm189_vm15, %v188_v62  }
  0xb8   :  { %v195_v63 = vld [vmem:[#allocation0] sm:$0x1] }
  0xb9   :  { %198 = vst [vmem:[%s402_s1] sm:$0x1] %v195_v63 }

// kernel: unet_block_up_forward.5
= control target key start
LH: loop header
LB: loop body
LE: loop exit
PB: predicated region body
PF: predicated region fallthrough
CT: control target
= control target key end

     0   :  { %s1062_s18 = smov 0   ;;  %s1316_s0 = inlined_call_operand.vmem [shape: f32[2,18,128], index: 0, kind: input, shape index: {}]   ;;  %s1317_s1 = inlined_call_operand.vmem [shape: f32[1,128], index: 1, kind: input, shape index: {}]   ;;  %s1318_s2 = inlined_call_operand.vmem [shape: f32[1,128], index: 2, kind: input, shape index: {}]   ;;  %s1319_s3 = inlined_call_operand.vmem [shape: f32[2,2,128,128], index: 3, kind: input, shape index: {}]   ;;  %s1320_s4 = inlined_call_operand.vmem [shape: f32[1,128], index: 4, kind: input, shape index: {}]   ;;  %s1321_s5 = inlined_call_operand.vmem [shape: f32[2,2,16,128], index: 5, kind: output, shape index: {}]  }
   0x1 LB: > { %s737_s19 = sadd.s32 4294967295, %s1030_s18   ;;  %p741_p0 = scmp.ge.s32.totalorder %s1030_s18, 1  ;;  %s1030_s18 = sphi %s1062_s18, %s15_s18  }
   0x2   : > { %p187_p1 = scmp.lt.s32.totalorder %s1030_s18, 3 }
   0x4   : > { %p188_p2 = pnand %p741_p0, %p187_p1 }
   0x5   : > { %p215_p3 = scmp.lt.s32.totalorder (!%p188_p2), %s737_s19, 1 }
   0x6   : > { %191 = sbr.rel (%p188_p2) target bundleno = 280 (0x118), region = 40 }
   0xb   : > { %v762_v0 = vld [vmem:[%s1319_s3 + $0xf8] sm:$0xff]  ;;  %v761_v2 = vld [vmem:[%s1319_s3 + $0xf0] sm:$0xff]  ;;  %v760_v4 = vld [vmem:[%s1319_s3 + $0xe8] sm:$0xff]  ;;  %s1323_s19 = smov (!%p215_p3, %s737_s19), 1  ;;  %v225_v12 = vlaneseq  ;;  %vm309_vm2 = vcmask 1046528   ;;  %vm512_vm3 = vcmask 1045504  }
   0xc   : > { %v288_v1 = vld [vmem:[%s1319_s3 + $0x78] sm:$0xff]  ;;  %875 = vmatprep.subr.mxu0 %v762_v0  ;;  %v287_v3 = vld [vmem:[%s1319_s3 + $0x70] sm:$0xff]  ;;  %v286_v5 = vld [vmem:[%s1319_s3 + $0x68] sm:$0xff]  ;;  %s1015_s11 = smul.u32 24, %s1323_s19  ;;  %s802_s16 = sshll.u32 %s1323_s19, 5 }
   0xd   : > { %910 = vmatprep.subr.mxu1 %v288_v1  ;;  %876 = vmatpush3.msra.mxu0 %v762_v0  ;;  %v759_v6 = vld [vmem:[%s1319_s3 + $0xe0] sm:$0xff]  ;;  %v758_v8 = vld [vmem:[%s1319_s3 + $0xd8] sm:$0xff]  ;;  %v757_v10 = vld [vmem:[%s1319_s3 + $0xd0] sm:$0xff]  ;;  %v1130_v23 = vshrl.u32 %v225_v12, 7  ;;  %s224_s23 = scalar_lea.vmem %s1321_s5, %s802_s16 }
   0xe   : > { %911 = vmatpush3.msra.mxu1 %v288_v1  ;;  %877 = vmatprep.subr.mxu0 %v761_v2  ;;  %v285_v7 = vld [vmem:[%s1319_s3 + $0x60] sm:$0xff]  ;;  %v284_v9 = vld [vmem:[%s1319_s3 + $0x58] sm:$0xff]  ;;  %s219_s20 = scalar_lea.vmem %s1316_s0, %s1015_s11  ;;  %v283_v11 = vld [vmem:[%s1319_s3 + $0x50] sm:$0xff] }
   0xf   : > { %912 = vmatprep.subr.mxu1 %v287_v3  ;;  %878 = vmatpush3.msra.mxu0 %v761_v2  ;;  %v756_v13 = vld [vmem:[%s1319_s3 + $0xc8] sm:$0xff]  ;;  %v238_v15 = vld [vmem:[%s219_s20] sm:$0xff]  ;;  %v240_v22 = vld [vmem:[%s219_s20 + $0x10] sm:$0x3]  ;;  %v228_v33 = vadd.s32 16, %v1130_v23  ;;  %vm229_vm0 = vcmp.ge.s32.totalorder %v1130_v23, 1 }
  0x10   : > { %913 = vmatpush3.msra.mxu1 %v287_v3  ;;  %879 = vmatprep.subr.mxu0 %v760_v4  ;;  %v282_v14 = vld [vmem:[%s1319_s3 + $0x48] sm:$0xff]  ;;  %v745_v17 = vld [vmem:[%s1317_s1] ss:$0 sm:$0xff]  ;;  %v754_v26 = vld [vmem:[%s1319_s3 + $0xb8] sm:$0xff] }
  0x11   : > { %914 = vmatprep.subr.mxu1 %v286_v5  ;;  %880 = vmatpush3.msra.mxu0 %v760_v4  ;;  %v239_v16 = vld [vmem:[%s219_s20 + $0x8] sm:$0xff]  ;;  %v746_v18 = vld [vmem:[%s1318_s2] ss:$0 sm:$0xff]  ;;  %v248_v21 = vmul.f32 %v745_v17, %v238_v15  ;;  %v250_v25 = vmul.f32 %v745_v17, %v240_v22  ;;  %v280_v27 = vld [vmem:[%s1319_s3 + $0x38] sm:$0xff]  ;;  %vm234_vm1 = vcmp.le.s32.totalorder %v228_v33, 16 }
  0x12   : > { %915 = vmatpush3.msra.mxu1 %v286_v5  ;;  %881 = vmatprep.subr.mxu0 %v759_v6  ;;  %v755_v19 = vld [vmem:[%s1319_s3 + $0xc0] sm:$0xff]  ;;  %v249_v24 = vmul.f32 %v745_v17, %v239_v16  ;;  %v753_v29 = vld [vmem:[%s1319_s3 + $0xb0] sm:$0xff]  ;;  %v752_v34 = vld [vmem:[%s1319_s3 + $0xa8] sm:$0xff] }
  0x13   : > { %916 = vmatprep.subr.mxu1 %v285_v7  ;;  %882 = vmatpush3.msra.mxu0 %v759_v6  ;;  %v281_v20 = vld [vmem:[%s1319_s3 + $0x40] sm:$0xff]  ;;  %v1138_v28 = vadd.f32 %v746_v18, %v248_v21  ;;  %v279_v30 = vld [vmem:[%s1319_s3 + $0x30] sm:$0xff]  ;;  %v260_v31 = vadd.f32 %v746_v18, %v250_v25  ;;  %v278_v35 = vld [vmem:[%s1319_s3 + $0x28] sm:$0xff] }
  0x14   : > { %917 = vmatpush3.msra.mxu1 %v285_v7  ;;  %883 = vmatprep.subr.mxu0 %v758_v8  ;;  %v259_v32 = vadd.f32 %v746_v18, %v249_v24  ;;  %v751_v37 = vld [vmem:[%s1319_s3 + $0xa0] sm:$0xff]  ;;  %v750_v41 = vld [vmem:[%s1319_s3 + $0x98] sm:$0xff]  ;;  %v749_v44 = vld [vmem:[%s1319_s3 + $0x90] sm:$0xff] }
  0x15   : > { %918 = vmatprep.subr.mxu1 %v284_v9  ;;  %884 = vmatpush3.msra.mxu0 %v758_v8  ;;  %v261_v36 = vmax.f32 %v1138_v28, 0.0  ;;  %v277_v38 = vld [vmem:[%s1319_s3 + $0x20] sm:$0xff]  ;;  %v263_v39 = vmax.f32 %v260_v31, 0.0  ;;  %v276_v42 = vld [vmem:[%s1319_s3 + $0x18] sm:$0xff]  ;;  %v275_v45 = vld [vmem:[%s1319_s3 + $0x10] sm:$0xff] }
  0x16   : > { %919 = vmatpush3.msra.mxu1 %v284_v9  ;;  %885 = vmatprep.subr.mxu0 %v757_v10  ;;  %v1161_v40 = vmax.f32 %v259_v32, 0.0  ;;  %v748_v49 = vld [vmem:[%s1319_s3 + $0x88] sm:$0xff]  ;;  %v747_v52 = vld [vmem:[%s1319_s3 + $0x80] sm:$0xff]  ;;  %v796_v56 = vld [vmem:[%s1319_s3 + $0x1f8] sm:$0xff] }
  0x17   : > { %920 = vmatprep.subr.mxu1 %v283_v11  ;;  %886 = vmatpush3.msra.mxu0 %v757_v10  ;;  %v1171_v43 = vsel %vm229_vm0, %v261_v36, 0.0  ;;  %v1179_v46 = vsel %vm234_vm1, %v263_v39, 0.0  ;;  %v274_v50 = vld [vmem:[%s1319_s3 + $0x8] sm:$0xff]  ;;  %v273_v53 = vld [vmem:[%s1319_s3] sm:$0xff]  ;;  %v780_v57 = vld [vmem:[%s1319_s3 + $0x178] sm:$0xff] }
  0x18   : > { %921 = vmatpush3.msra.mxu1 %v283_v11  ;;  %887 = vmatprep.subr.mxu0 %v756_v13  ;;  %v310_v47 = vrot.slane %v1171_v43, 1  ;;  %v311_v48 = vrot.slane %v1161_v40, 1  ;;  %v313_v51 = vrot.slane %v1179_v46, 1  ;;  %v795_v58 = vld [vmem:[%s1319_s3 + $0x1f0] sm:$0xff]  ;;  %v794_v60 = vld [vmem:[%s1319_s3 + $0x1e8] sm:$0xff]  ;;  %v793_v62 = vld [vmem:[%s1319_s3 + $0x1e0] sm:$0xff] }
  0x19   : > { %922 = vmatprep.subr.mxu1 %v282_v14  ;;  %888 = vmatpush3.msra.mxu0 %v756_v13  ;;  %v779_v59 = vld [vmem:[%s1319_s3 + $0x170] sm:$0xff]  ;;  %v778_v61 = vld [vmem:[%s1319_s3 + $0x168] sm:$0xff]  ;;  %v777_v63 = vld [vmem:[%s1319_s3 + $0x160] sm:$0xff]  ;;  %v514_v21 = vrot.slane %v1161_v40, 2  ;;  %v516_v24 = vrot.slane %v1179_v46, 2 }
  0x1a   : > { %923 = vmatpush3.msra.mxu1 %v282_v14  ;;  %889 = vmatprep.subr.mxu0 %v755_v19  ;;  %v1196_v54 = vsel %vm309_vm2, %v310_v47, %v311_v48  ;;  %v1198_v55 = vsel %vm309_vm2, %v311_v48, %v313_v51  ;;  %v792_v0 = vld [vmem:[%s1319_s3 + $0x1d8] sm:$0xff]  ;;  %v791_v2 = vld [vmem:[%s1319_s3 + $0x1d0] sm:$0xff]  ;;  %v790_v4 = vld [vmem:[%s1319_s3 + $0x1c8] sm:$0xff] }
  0x1b   : > { %924 = vmatprep.subr.mxu1 %v281_v20  ;;  %890 = vmatpush3.msra.mxu0 %v755_v19  ;;  %v776_v1 = vld [vmem:[%s1319_s3 + $0x158] sm:$0xff]  ;;  %v775_v3 = vld [vmem:[%s1319_s3 + $0x150] sm:$0xff]  ;;  %v774_v5 = vld [vmem:[%s1319_s3 + $0x148] sm:$0xff]  ;;  %v517_v28 = vsel %vm512_vm3, %v514_v21, %v516_v24 }
  0x1c   : > { %925 = vmatpush3.msra.mxu1 %v281_v20  ;;  %891 = vmatprep.subr.mxu0 %v754_v26  ;;  %v789_v6 = vld [vmem:[%s1319_s3 + $0x1c0] sm:$0xff]  ;;  %v788_v8 = vld [vmem:[%s1319_s3 + $0x1b8] sm:$0xff]  ;;  %v787_v10 = vld [vmem:[%s1319_s3 + $0x1b0] sm:$0xff]  ;;  %v513_v20 = vrot.slane %v1171_v43, 2 }
  0x1d   : > { %926 = vmatprep.subr.mxu1 %v280_v27  ;;  %892 = vmatpush3.msra.mxu0 %v754_v26  ;;  %v773_v7 = vld [vmem:[%s1319_s3 + $0x140] sm:$0xff]  ;;  %v772_v9 = vld [vmem:[%s1319_s3 + $0x138] sm:$0xff]  ;;  %v771_v11 = vld [vmem:[%s1319_s3 + $0x130] sm:$0xff] }
  0x1e   : > { %927 = vmatpush3.msra.mxu1 %v280_v27  ;;  %893 = vmatprep.subr.mxu0 %v753_v29  ;;  %v786_v12 = vld [vmem:[%s1319_s3 + $0x1a8] sm:$0xff]  ;;  %v785_v14 = vld [vmem:[%s1319_s3 + $0x1a0] sm:$0xff]  ;;  %v784_v16 = vld [vmem:[%s1319_s3 + $0x198] sm:$0xff]  ;;  %v515_v27 = vsel %vm512_vm3, %v513_v20, %v514_v21 }
  0x1f   : > { %928 = vmatprep.subr.mxu1 %v279_v30  ;;  %894 = vmatpush3.msra.mxu0 %v753_v29  ;;  %v770_v13 = vld [vmem:[%s1319_s3 + $0x128] sm:$0xff]  ;;  %v769_v15 = vld [vmem:[%s1319_s3 + $0x120] sm:$0xff]  ;;  %v768_v17 = vld [vmem:[%s1319_s3 + $0x118] sm:$0xff] }
  0x20   : > { %929 = vmatpush3.msra.mxu1 %v279_v30  ;;  %895 = vmatprep.subr.mxu0 %v752_v34  ;;  %v783_v18 = vld [vmem:[%s1319_s3 + $0x190] sm:$0xff]  ;;  %v782_v22 = vld [vmem:[%s1319_s3 + $0x188] sm:$0xff]  ;;  %v781_v25 = vld [vmem:[%s1319_s3 + $0x180] sm:$0xff] }
  0x21   : > { %930 = vmatprep.subr.mxu1 %v278_v35  ;;  %896 = vmatpush3.msra.mxu0 %v752_v34  ;;  %v767_v19 = vld [vmem:[%s1319_s3 + $0x110] sm:$0xff]  ;;  %v766_v23 = vld [vmem:[%s1319_s3 + $0x108] sm:$0xff]  ;;  %v765_v26 = vld [vmem:[%s1319_s3 + $0x100] sm:$0xff] }
  0x22   : > { %931 = vmatpush3.msra.mxu1 %v278_v35  ;;  %897 = vmatprep.subr.mxu0 %v751_v37  ;;  %v764_v31 = vld [vmem:[%s1320_s4] ss:$0 sm:$0xff] }
  0x23   : > { %932 = vmatprep.subr.mxu1 %v277_v38  ;;  %898 = vmatpush3.msra.mxu0 %v751_v37 }
  0x24   : > { %933 = vmatpush3.msra.mxu1 %v277_v38  ;;  %899 = vmatprep.subr.mxu0 %v750_v41 }
  0x25   : > { %934 = vmatprep.subr.mxu1 %v276_v42  ;;  %900 = vmatpush3.msra.mxu0 %v750_v41 }
  0x26   : > { %935 = vmatpush3.msra.mxu1 %v276_v42  ;;  %901 = vmatprep.subr.mxu0 %v749_v44 }
  0x27   : > { %936 = vmatprep.subr.mxu1 %v275_v45  ;;  %902 = vmatpush3.msra.mxu0 %v749_v44 }
  0x28   : > { %937 = vmatpush3.msra.mxu1 %v275_v45  ;;  %903 = vmatprep.subr.mxu0 %v748_v49 }
  0x29   : > { %938 = vmatprep.subr.mxu1 %v274_v50  ;;  %904 = vmatpush3.msra.mxu0 %v748_v49 }
  0x2a   : > { %939 = vmatpush3.msra.mxu1 %v274_v50  ;;  %905 = vmatprep.subr.mxu0 %v747_v52 }
  0x2b   : > { %940 = vmatprep.subr.mxu1 %v273_v53  ;;  %906 = vmatpush3.msra.mxu0 %v747_v52 }
  0x2c   : > { %907 = vmatprep.mubr.f32.mxu0 %v1196_v54  ;;  %941 = vmatpush3.msra.mxu1 %v273_v53 }
  0x2d   : > { %942 = vmatprep.mubr.msk.f32.mxu1 %vm229_vm0, %v261_v36  ;;  %908 = vmatmul.mubr.f32.vlgmr.msra.gmra.mxu0 %v1198_v55 }
  0x2e   : > { %943 = vmatmul.mubr.f32.vlgmr.msra.gmra.mxu1 %v1161_v40  ;;  %945 = vmatprep.subr.mxu0 %v796_v56 }
  0x2f   : > { %980 = vmatprep.subr.mxu1 %v780_v57  ;;  %946 = vmatpush3.msra.mxu0 %v796_v56 }
  0x30   : > { %981 = vmatpush3.msra.mxu1 %v780_v57  ;;  %947 = vmatprep.subr.mxu0 %v795_v58 }
  0x31   : > { %982 = vmatprep.subr.mxu1 %v779_v59  ;;  %948 = vmatpush3.msra.mxu0 %v795_v58 }
  0x32   : > { %983 = vmatpush3.msra.mxu1 %v779_v59  ;;  %949 = vmatprep.subr.mxu0 %v794_v60 }
  0x33   : > { %984 = vmatprep.subr.mxu1 %v778_v61  ;;  %950 = vmatpush3.msra.mxu0 %v794_v60 }
  0x34   : > { %985 = vmatpush3.msra.mxu1 %v778_v61  ;;  %951 = vmatprep.subr.mxu0 %v793_v62 }
  0x35   : > { %986 = vmatprep.subr.mxu1 %v777_v63  ;;  %952 = vmatpush3.msra.mxu0 %v793_v62 }
  0x36   : > { %987 = vmatpush3.msra.mxu1 %v777_v63  ;;  %953 = vmatprep.subr.mxu0 %v792_v0 }
  0x37   : > { %988 = vmatprep.subr.mxu1 %v776_v1  ;;  %954 = vmatpush3.msra.mxu0 %v792_v0 }
  0x38   : > { %989 = vmatpush3.msra.mxu1 %v776_v1  ;;  %955 = vmatprep.subr.mxu0 %v791_v2 }
  0x39   : > { %990 = vmatprep.subr.mxu1 %v775_v3  ;;  %956 = vmatpush3.msra.mxu0 %v791_v2 }
  0x3a   : > { %991 = vmatpush3.msra.mxu1 %v775_v3  ;;  %957 = vmatprep.subr.mxu0 %v790_v4 }
  0x3b   : > { %992 = vmatprep.subr.mxu1 %v774_v5  ;;  %958 = vmatpush3.msra.mxu0 %v790_v4 }
  0x3c   : > { %993 = vmatpush3.msra.mxu1 %v774_v5  ;;  %959 = vmatprep.subr.mxu0 %v789_v6 }
  0x3d   : > { %994 = vmatprep.subr.mxu1 %v773_v7  ;;  %960 = vmatpush3.msra.mxu0 %v789_v6 }
  0x3e   : > { %995 = vmatpush3.msra.mxu1 %v773_v7  ;;  %961 = vmatprep.subr.mxu0 %v788_v8 }
  0x3f   : > { %996 = vmatprep.subr.mxu1 %v772_v9  ;;  %962 = vmatpush3.msra.mxu0 %v788_v8 }
  0x40   : > { %997 = vmatpush3.msra.mxu1 %v772_v9  ;;  %963 = vmatprep.subr.mxu0 %v787_v10 }
  0x41   : > { %998 = vmatprep.subr.mxu1 %v771_v11  ;;  %964 = vmatpush3.msra.mxu0 %v787_v10 }
  0x42   : > { %999 = vmatpush3.msra.mxu1 %v771_v11  ;;  %965 = vmatprep.subr.mxu0 %v786_v12 }
  0x43   : > { %1000 = vmatprep.subr.mxu1 %v770_v13  ;;  %966 = vmatpush3.msra.mxu0 %v786_v12 }
  0x44   : > { %1001 = vmatpush3.msra.mxu1 %v770_v13  ;;  %967 = vmatprep.subr.mxu0 %v785_v14 }
  0x45   : > { %1002 = vmatprep.subr.mxu1 %v769_v15  ;;  %968 = vmatpush3.msra.mxu0 %v785_v14 }
  0x46   : > { %1003 = vmatpush3.msra.mxu1 %v769_v15  ;;  %969 = vmatprep.subr.mxu0 %v784_v16 }
  0x47   : > { %1004 = vmatprep.subr.mxu1 %v768_v17  ;;  %970 = vmatpush3.msra.mxu0 %v784_v16 }
  0x48   : > { %1005 = vmatpush3.msra.mxu1 %v768_v17  ;;  %971 = vmatprep.subr.mxu0 %v783_v18 }
  0x49   : > { %1006 = vmatprep.subr.mxu1 %v767_v19  ;;  %972 = vmatpush3.msra.mxu0 %v783_v18 }
  0x4a   : > { %1007 = vmatpush3.msra.mxu1 %v767_v19  ;;  %973 = vmatprep.subr.mxu0 %v782_v22 }
  0x4b   : > { %1008 = vmatprep.subr.mxu1 %v766_v23  ;;  %974 = vmatpush3.msra.mxu0 %v782_v22 }
  0x4c   : > { %1009 = vmatpush3.msra.mxu1 %v766_v23  ;;  %975 = vmatprep.subr.mxu0 %v781_v25 }
  0x4d   : > { %1010 = vmatprep.subr.mxu1 %v765_v26  ;;  %976 = vmatpush3.msra.mxu0 %v781_v25 }
  0x4e   : > { %977 = vmatprep.mubr.f32.mxu0 %v515_v27  ;;  %1011 = vmatpush3.msra.mxu1 %v765_v26 }
  0x4f   : > { %1012 = vmatprep.mubr.f32.mxu1 %v1196_v54  ;;  %978 = vmatmul.mubr.f32.vlgmr.msra.gmra.mxu0 %v517_v28 }
  0x50   : > { %1013 = vmatmul.mubr.f32.vlgmr.msra.gmra.mxu1 %v1198_v55 }
  0xed   : > { %v909_v29 = vpop.f32.mrf.mxu0 }
  0xee   : > { %v944_v30 = vpop.f32.mrf.mxu1 }
  0xef   : > { %v464_v32 = vadd.f32 %v944_v30, %v909_v29  ;;  %v383_v33 = vpop.f32.mrf.mxu0 }
  0xf0   : > { %v458_v34 = vpop.f32.mrf.mxu1 }
  0xf1   : > { %v475_v35 = vadd.f32 %v764_v31, %v464_v32  ;;  %v459_v36 = vadd.f32 %v458_v34, %v383_v33 }
  0xf3   : > { %477 = vst [vmem:[%s224_s23 + $0x8] sm:$0xff] %v475_v35  ;;  %v474_v37 = vadd.f32 %v764_v31, %v459_v36 }
  0xf5   : > { %476 = vst [vmem:[%s224_s23] sm:$0xff] %v474_v37 }
 0x10f   : > { %v979_v38 = vpop.f32.mrf.mxu0 }
 0x110   : > { %v1014_v39 = vpop.f32.mrf.mxu1 }
 0x111   : > { %v667_v40 = vadd.f32 %v1014_v39, %v979_v38  ;;  %v586_v41 = vpop.f32.mrf.mxu0 }
 0x112   : > { %v661_v42 = vpop.f32.mrf.mxu1 }
 0x113   : > { %v678_v43 = vadd.f32 %v764_v31, %v667_v40  ;;  %v662_v44 = vadd.f32 %v661_v42, %v586_v41 }
 0x115   : > { %799 = vst [vmem:[%s224_s23 + $0x18] sm:$0xff] %v678_v43  ;;  %v677_v45 = vadd.f32 %v764_v31, %v662_v44 }
 0x117   : > { %798 = vst [vmem:[%s224_s23 + $0x10] sm:$0xff] %v677_v45 }
 0x118 PF: > { %s15_s18 = sadd.s32 1, %s1030_s18  }
 0x119   : > { %p12_p4 = scmp.ge.s32.totalorder %s15_s18, 4  }
 0x11b   :  { %14 = sbr.rel (!%p12_p4) target bundleno = 1 (0x1), region = 74 }

</bundles_post_ra>
